<compile_context>
chip_gen: v5e
topology: v5e:2x2
jax: 0.10.0
libtpu: 0.0.40
codegen_flags: <defaults>
</compile_context>

<pallas_src>
import functools

import jax
import jax.numpy as jnp
from jax.experimental import pallas as pl
from jax.experimental.pallas import tpu as pltpu

_VMEM = pl.BlockSpec(memory_space=pltpu.MemorySpace.VMEM)
_BN_EPS = 1e-5


# -----------------------------------------------------------------------------
# im2col / index glue (pure layout / metadata work, stays in plain JAX)
# -----------------------------------------------------------------------------
def _im2col(x_nhwc):
    """(N,H,W,Cin) -> (N*OH*OW, 9*Cin), rows ordered (n, oh, ow)."""
    N, H, W, Cin = x_nhwc.shape
    OH, OW = H - 2, W - 2
    M = N * OH * OW
    taps = [
        x_nhwc[:, dy : dy + OH, dx : dx + OW, :].reshape(M, Cin)
        for dy in range(3)
        for dx in range(3)
    ]
    return jnp.concatenate(taps, axis=-1)


def _im2col_pool_order(x_nhwc):
    """(N,H,W,Cin) -> (4*Mp, 9*Cin); rows ordered (pool_tap, n, oh2, ow2).

    Requires the conv output dims OH, OW to be even (caller guarantees).
    pool_tap = py*2 + px indexes the 2x2 pooling window in row-major order.
    """
    N, H, W, Cin = x_nhwc.shape
    OH, OW = H - 2, W - 2
    OH2, OW2 = OH // 2, OW // 2
    Mp = N * OH2 * OW2
    taps = []
    for dy in range(3):
        for dx in range(3):
            win = x_nhwc[:, dy : dy + OH, dx : dx + OW, :]
            win = win.reshape(N, OH2, 2, OW2, 2, Cin)
            win = jnp.transpose(win, (2, 4, 0, 1, 3, 5)).reshape(4 * Mp, Cin)
            taps.append(win)
    return jnp.concatenate(taps, axis=-1)


def _pool_base_indices(N, OH2, OW2, pool_in_w):
    """Flat (h*W + w) index of the top-left element of each 2x2 window, (Mp,1) i32."""
    oh2 = jnp.arange(OH2, dtype=jnp.int32)
    ow2 = jnp.arange(OW2, dtype=jnp.int32)
    base = (2 * oh2[:, None]) * pool_in_w + 2 * ow2[None, :]  # (OH2, OW2)
    base = jnp.broadcast_to(base[None], (N, OH2, OW2))
    return base.reshape(N * OH2 * OW2, 1)


# -----------------------------------------------------------------------------
# Kernel 1: fused 3x3 valid conv (single K=9*Cin matmul) + BatchNorm2d + ReLU
# BatchNorm uses training-mode batch statistics (gamma=1 / beta=0 init).
# -----------------------------------------------------------------------------
def _conv3x3_bn_relu_kernel(p_ref, w_ref, g_ref, beta_ref, o_ref):
    # p_ref: (M, 9*Cin) bf16; w_ref: (9*Cin, Cout) bf16; g/beta: (1, Cout) f32
    acc = jnp.dot(p_ref[...], w_ref[...], preferred_element_type=jnp.float32)
    m = acc.shape[0]
    inv_m = 1.0 / m
    s = jnp.sum(acc, axis=0, keepdims=True)
    ss = jnp.sum(acc * acc, axis=0, keepdims=True)
    mean = s * inv_m
    var = jnp.maximum(ss * inv_m - mean * mean, 0.0)
    scale = g_ref[...] * jax.lax.rsqrt(var + _BN_EPS)
    y = (acc - mean) * scale + beta_ref[...]
    o_ref[...] = jnp.maximum(y, 0.0).astype(o_ref.dtype)


def conv3x3_bn_relu(x_nhwc, w_flat, gamma, beta):
    N, H, W, _ = x_nhwc.shape
    OH, OW = H - 2, W - 2
    M = N * OH * OW
    Cout = w_flat.shape[-1]
    patches = _im2col(x_nhwc)
    out = pl.pallas_call(
        _conv3x3_bn_relu_kernel,
        out_shape=jax.ShapeDtypeStruct((M, Cout), jnp.bfloat16),
        in_specs=[_VMEM] * 4,
        out_specs=_VMEM,
    )(patches, w_flat, gamma, beta)
    return out.reshape(N, OH, OW, Cout)


# -----------------------------------------------------------------------------
# Kernel 2: conv3x3 + BN + ReLU + MaxPool2d(2,2,return_indices=True) fused.
# Rows of the conv output are grouped by pool tap (contiguous Mp-row blocks),
# so the 2x2 selection is 3 compares on static row slices, no relayout.
# -----------------------------------------------------------------------------
def _conv3x3_bn_relu_pool_kernel(
    p_ref, w_ref, g_ref, beta_ref, base_ref, o_ref, idx_ref, *, pool_in_w
):
    Mp, C = o_ref.shape
    acc = jnp.dot(p_ref[...], w_ref[...], preferred_element_type=jnp.float32)  # (4*Mp, C)
    m = acc.shape[0]
    inv_m = 1.0 / m
    s = jnp.sum(acc, axis=0, keepdims=True)
    ss = jnp.sum(acc * acc, axis=0, keepdims=True)
    mean = s * inv_m
    var = jnp.maximum(ss * inv_m - mean * mean, 0.0)
    scale = g_ref[...] * jax.lax.rsqrt(var + _BN_EPS)
    y = jnp.maximum((acc - mean) * scale + beta_ref[...], 0.0)

    # 2x2 max + argmax, scan order (0,0),(0,1),(1,0),(1,1) -> first-max wins (PyTorch).
    best_v = y[0:Mp, :]
    best_i = jnp.broadcast_to(base_ref[...], (Mp, C))
    for k in range(1, 4):
        py, px = divmod(k, 2)
        v = y[k * Mp : (k + 1) * Mp, :]
        ci = base_ref[...] + (py * pool_in_w + px)
        take = v > best_v
        best_i = jnp.where(take, ci, best_i)
        best_v = jnp.where(take, v, best_v)
    o_ref[...] = best_v.astype(o_ref.dtype)
    idx_ref[...] = best_i


def conv3x3_bn_relu_pool(x_nhwc, w_flat, gamma, beta):
    N, H, W, _ = x_nhwc.shape
    OH, OW = H - 2, W - 2
    OH2, OW2 = OH // 2, OW // 2
    Mp = N * OH2 * OW2
    Cout = w_flat.shape[-1]
    patches = _im2col_pool_order(x_nhwc)
    base = _pool_base_indices(N, OH2, OW2, OW)
    out, idx = pl.pallas_call(
        functools.partial(_conv3x3_bn_relu_pool_kernel, pool_in_w=OW),
        out_shape=(
            jax.ShapeDtypeStruct((Mp, Cout), jnp.bfloat16),
            # TODO(synk): PyTorch returns int64 pool indices; TPU kernel emits int32.
            jax.ShapeDtypeStruct((Mp, Cout), jnp.int32),
        ),
        in_specs=[_VMEM] * 5,
        out_specs=(_VMEM, _VMEM),
    )(patches, w_flat, gamma, beta, base)
    return out.reshape(N, OH2, OW2, Cout), idx.reshape(N, OH2, OW2, Cout)


# -----------------------------------------------------------------------------
# Kernel 3: standalone MaxPool2d(2,2) fallback (odd spatial dims only):
# single contiguous input (pool-tap outer) + precomputed base indices.
# -----------------------------------------------------------------------------
def _maxpool2x2_kernel(v_ref, base_ref, o_ref, idx_ref, *, pool_in_w):
    Mp, C = o_ref.shape
    y = v_ref[...].astype(jnp.float32)
    best_v = y[0:Mp, :]
    best_i = jnp.broadcast_to(base_ref[...], (Mp, C))
    for k in range(1, 4):
        py, px = divmod(k, 2)
        v = y[k * Mp : (k + 1) * Mp, :]
        ci = base_ref[...] + (py * pool_in_w + px)
        take = v > best_v
        best_i = jnp.where(take, ci, best_i)
        best_v = jnp.where(take, v, best_v)
    o_ref[...] = best_v.astype(o_ref.dtype)
    idx_ref[...] = best_i


def maxpool2x2_with_indices(x_nhwc):
    N, H, W, C = x_nhwc.shape
    OH2, OW2 = H // 2, W // 2  # floor, like MaxPool2d(2, 2)
    Mp = N * OH2 * OW2
    xc = x_nhwc[:, : 2 * OH2, : 2 * OW2, :]
    xr = xc.reshape(N, OH2, 2, OW2, 2, C)
    xr = jnp.transpose(xr, (2, 4, 0, 1, 3, 5)).reshape(4 * Mp, C)
    base = _pool_base_indices(N, OH2, OW2, W)
    out, idx = pl.pallas_call(
        functools.partial(_maxpool2x2_kernel, pool_in_w=W),
        out_shape=(
            jax.ShapeDtypeStruct((Mp, C), x_nhwc.dtype),
            jax.ShapeDtypeStruct((Mp, C), jnp.int32),
        ),
        in_specs=[_VMEM] * 2,
        out_specs=(_VMEM, _VMEM),
    )(xr, base)
    return out.reshape(N, OH2, OW2, C), idx.reshape(N, OH2, OW2, C)


# -----------------------------------------------------------------------------
# Kernel 4: 1x1 conv == matmul over channels (+ bias); 256 output lanes (dense).
# -----------------------------------------------------------------------------
def _conv1x1_kernel(x_ref, w_ref, b_ref, o_ref):
    o_ref[...] = (
        jnp.dot(x_ref[...], w_ref[...], preferred_element_type=jnp.float32)
        + b_ref[...]
    )


def conv1x1(x_nhwc, w, b):
    N, H, W, Cin = x_nhwc.shape
    Cout = w.shape[-1]
    M = N * H * W
    out = pl.pallas_call(
        _conv1x1_kernel,
        out_shape=jax.ShapeDtypeStruct((M, Cout), jnp.float32),
        in_specs=[_VMEM] * 3,
        out_specs=_VMEM,
    )(x_nhwc.reshape(M, Cin), w, b)
    return out.reshape(N, H, W, Cout)


# -----------------------------------------------------------------------------
# Module wrapper
# -----------------------------------------------------------------------------
class HorseshoeEncoderPallas:
    def __init__(self, architecture=((2, 16), (2, 32)), in_channels=3, seed=0):
        key = jax.random.PRNGKey(seed)
        self.blocks = []
        c_in = in_channels
        for (n_blocks, c_out) in architecture:
            layers = []
            for _ in range(n_blocks):
                key, k1 = jax.random.split(key)
                w = jax.random.normal(k1, (3, 3, c_in, c_out), jnp.float32) * 0.1
                # Conv2d bias preceding train-mode BatchNorm is exactly cancelled by
                # the mean subtraction -> omitted (zero numerical change).
                gamma = jnp.ones((1, c_out), jnp.float32)   # BatchNorm2d default init
                beta = jnp.zeros((1, c_out), jnp.float32)
                layers.append(
                    (w.reshape(9 * c_in, c_out).astype(jnp.bfloat16), gamma, beta)
                )
                c_in = c_out
            self.blocks.append(layers)
        key, k1, k2 = jax.random.split(key, 3)
        self.w1x1 = (jax.random.normal(k1, (c_in, 256), jnp.float32) * 0.1).astype(
            jnp.bfloat16
        )
        self.b1x1 = (jax.random.normal(k2, (256,), jnp.float32) * 0.01).reshape(1, 256)
        # TODO(synk): BatchNorm running-stat updates are a training side effect and
        # not part of the functional forward output; not reproduced.

    def __call__(self, x_nchw):
        # NCHW -> NHWC, carry activations in bf16 (matmul operands); accum/BN in f32.
        x = jnp.transpose(x_nchw, (0, 2, 3, 1)).astype(jnp.bfloat16)
        pooling_indices = []
        input_sizes = []
        for layers in self.blocks:
            for (wf, g, be) in layers[:-1]:
                x = conv3x3_bn_relu(x, wf, g, be)
            wf, g, be = layers[-1]
            N, H, W, _ = x.shape
            OH, OW = H - 2, W - 2
            c_out = wf.shape[-1]
            input_sizes.append((N, c_out, OH, OW))  # like torch.Size (NCHW), pre-pool
            if OH % 2 == 0 and OW % 2 == 0:
                x, idx = conv3x3_bn_relu_pool(x, wf, g, be)
            else:
                # odd dims: BN stats must cover the full map; pool separately.
                x = conv3x3_bn_relu(x, wf, g, be)
                x, idx = maxpool2x2_with_indices(x)
            pooling_indices.append(jnp.transpose(idx, (0, 3, 1, 2)))  # -> NCHW
        x = conv1x1(x, self.w1x1, self.b1x1)
        x = jnp.transpose(x, (0, 3, 1, 2))  # NHWC -> NCHW, f32
        return x, pooling_indices, input_sizes


if __name__ == "__main__":
    key = jax.random.PRNGKey(0)
    # small architecture so spatial dims stay valid at small input sizes
    x = jax.random.normal(key, (2, 3, 20, 20), jnp.float32)
    enc = HorseshoeEncoderPallas(architecture=((2, 16), (2, 32)), in_channels=3)

    out, pool_idx, sizes = enc(x)
    out = jax.block_until_ready(out)
    pool_idx = [jax.block_until_ready(i) for i in pool_idx]

    # sanity checks on shapes / metadata
    assert out.shape == (2, 256, 2, 2), out.shape
    assert sizes == [(2, 16, 16, 16), (2, 32, 4, 4)], sizes
    assert pool_idx[0].shape == (2, 16, 8, 8)
    assert pool_idx[1].shape == (2, 32, 2, 2)
    assert int(pool_idx[0].max()) < 16 * 16 and int(pool_idx[0].min()) >= 0
    assert int(pool_idx[1].max()) < 4 * 4 and int(pool_idx[1].min()) >= 0
    assert bool(jnp.all(jnp.isfinite(out)))

    print("KERNEL_OK")
</pallas_src>

<mosaic_0001>
module attributes {stable_mosaic.version = 11 : i64} {
  func.func @_conv3x3_bn_relu_kernel(%arg0: memref<648x27xbf16, #tpu.memory_space<vmem>>, %arg1: memref<27x16xbf16, #tpu.memory_space<vmem>>, %arg2: memref<1x16xf32, #tpu.memory_space<vmem>>, %arg3: memref<1x16xf32, #tpu.memory_space<vmem>>, %arg4: memref<648x16xbf16, #tpu.memory_space<vmem>>) attributes {dimension_semantics = [], scalar_prefetch = 0 : i64, scratch_operands = 0 : i64, tpu.core_type = #tpu.core_type<tc>} {
    %c0 = arith.constant 0 : index
    %c0_0 = arith.constant 0 : index
    %0 = vector.load %arg0[%c0, %c0_0] : memref<648x27xbf16, #tpu.memory_space<vmem>>, vector<648x27xbf16>
    %c0_1 = arith.constant 0 : index
    %c0_2 = arith.constant 0 : index
    %1 = vector.load %arg1[%c0_1, %c0_2] : memref<27x16xbf16, #tpu.memory_space<vmem>>, vector<27x16xbf16>
    %cst = arith.constant dense<0.000000e+00> : vector<648x16xf32>
    %2 = tpu.matmul %0, %1, %cst {dimension_numbers = #tpu.dot_dimension_numbers<[1], [0], [0], [1], [0, 0, 1, 1], [], []>} : vector<648x27xbf16>, vector<27x16xbf16>, vector<648x16xf32> -> vector<648x16xf32>
    %cst_3 = arith.constant dense<0.000000e+00> : vector<16xf32>
    %3 = vector.multi_reduction <add>, %2, %cst_3 [0] : vector<648x16xf32> to vector<16xf32>
    %4 = vector.shape_cast %3 : vector<16xf32> to vector<1x16xf32>
    %5 = arith.mulf %2, %2 : vector<648x16xf32>
    %cst_4 = arith.constant dense<0.000000e+00> : vector<16xf32>
    %6 = vector.multi_reduction <add>, %5, %cst_4 [0] : vector<648x16xf32> to vector<16xf32>
    %7 = vector.shape_cast %6 : vector<16xf32> to vector<1x16xf32>
    %cst_5 = arith.constant 0.00154320989 : f32
    %8 = vector.broadcast %cst_5 : f32 to vector<1x16xf32>
    %9 = arith.mulf %4, %8 : vector<1x16xf32>
    %cst_6 = arith.constant 0.00154320989 : f32
    %10 = vector.broadcast %cst_6 : f32 to vector<1x16xf32>
    %11 = arith.mulf %7, %10 : vector<1x16xf32>
    %12 = arith.mulf %9, %9 : vector<1x16xf32>
    %13 = arith.subf %11, %12 : vector<1x16xf32>
    %cst_7 = arith.constant 0.000000e+00 : f32
    %14 = vector.broadcast %cst_7 : f32 to vector<1x16xf32>
    %15 = arith.maximumf %13, %14 : vector<1x16xf32>
    %c0_8 = arith.constant 0 : index
    %c0_9 = arith.constant 0 : index
    %16 = vector.load %arg2[%c0_8, %c0_9] : memref<1x16xf32, #tpu.memory_space<vmem>>, vector<1x16xf32>
    %cst_10 = arith.constant 9.99999974E-6 : f32
    %17 = vector.broadcast %cst_10 : f32 to vector<1x16xf32>
    %18 = arith.addf %15, %17 : vector<1x16xf32>
    %19 = math.rsqrt %18 : vector<1x16xf32>
    %20 = arith.mulf %16, %19 : vector<1x16xf32>
    %21 = vector.broadcast %9 : vector<1x16xf32> to vector<648x16xf32>
    %22 = arith.subf %2, %21 : vector<648x16xf32>
    %23 = vector.broadcast %20 : vector<1x16xf32> to vector<648x16xf32>
    %24 = arith.mulf %22, %23 : vector<648x16xf32>
    %c0_11 = arith.constant 0 : index
    %c0_12 = arith.constant 0 : index
    %25 = vector.load %arg3[%c0_11, %c0_12] : memref<1x16xf32, #tpu.memory_space<vmem>>, vector<1x16xf32>
    %26 = vector.broadcast %25 : vector<1x16xf32> to vector<648x16xf32>
    %27 = arith.addf %24, %26 : vector<648x16xf32>
    %cst_13 = arith.constant 0.000000e+00 : f32
    %28 = vector.broadcast %cst_13 : f32 to vector<648x16xf32>
    %29 = arith.maximumf %27, %28 : vector<648x16xf32>
    %30 = arith.truncf %29 : vector<648x16xf32> to vector<648x16xbf16>
    %c0_14 = arith.constant 0 : index
    %c0_15 = arith.constant 0 : index
    %31 = vector.load %arg4[%c0_14, %c0_15] : memref<648x16xbf16, #tpu.memory_space<vmem>>, vector<648x16xbf16>
    tpu.vector_store %arg4[%c0_14, %c0_15], %30 {strides = array<i32>} : memref<648x16xbf16, #tpu.memory_space<vmem>>, vector<648x16xbf16>,
    return
  }
}

</mosaic_0001>

<bundles_post_ra>
// kernel: tpu_custom_call.1
= control target key start
LH: loop header
LB: loop body
LE: loop exit
PB: predicated region body
PF: predicated region fallthrough
CT: control target
= control target key end

     0   :  { %vm441_vm0 = vcmask 1044480   ;;  %vm442_vm1 = vcmask 1045504   ;;  %v1854_v2 = vmov 65535   ;;  %vm317_vm2 = vcmask 220160   ;;  %s3504_s1 = inlined_call_operand.vmem [shape: bf16[27,16], index: 1, kind: input, shape index: {}]   ;;  %s3505_s0 = inlined_call_operand.vmem [shape: bf16[648,27], index: 0, kind: input, shape index: {}]   ;;  %s3506_s3 = inlined_call_operand.vmem [shape: f32[1,16], index: 3, kind: input, shape index: {}]   ;;  %s3507_s2 = inlined_call_operand.vmem [shape: f32[1,16], index: 2, kind: input, shape index: {}]   ;;  %s3508_s4 = inlined_call_operand.vmem [shape: bf16[648,16], index: 4, kind: output, shape index: {}]  }
   0x1   :  { %v1759_v0 = vld [vmem:[%s3504_s1 + $0x8] sm:$0xf]  ;;  %v1843_v1 = vld [vmem:[%s3504_s1 + $0x8] sm:$0x30]  ;;  %v443_v3 = vsel %vm441_vm0, 4294967295, %v1854_v2  ;;  %v1842_v7 = vld [vmem:[%s3504_s1] sm:$0xff] }
   0x2   :  { %v1760_v4 = vor.u32 %v1843_v1, %v1759_v0  ;;  %v444_v5 = vsel %vm442_vm1, %v443_v3, 0  ;;  %v1802_v8 = vld [vmem:[%s3505_s0] sm:$0xff]  ;;  %v1812_v9 = vld [vmem:[%s3505_s0 + $0x50] sm:$0xff]  ;;  %v1803_v10 = vld [vmem:[%s3505_s0 + $0x8] sm:$0xff]  ;;  %vm661_vm3 = vcmask 130048   ;;  %vm1507_vm7 = vcmask 125952  }
   0x3   :  { %v1813_v11 = vld [vmem:[%s3505_s0 + $0x58] sm:$0xff]  ;;  %v1823_v12 = vld [vmem:[%s3505_s0 + $0xa8] sm:$0xff]  ;;  %v1804_v13 = vld [vmem:[%s3505_s0 + $0x10] sm:$0xff] }
   0x4   :  { %v446_v6 = vand.u32 %v1760_v4, %v444_v5  ;;  %v1814_v14 = vld [vmem:[%s3505_s0 + $0x60] sm:$0xff]  ;;  %v1824_v15 = vld [vmem:[%s3505_s0 + $0xb0] sm:$0xff]  ;;  %v1805_v16 = vld [vmem:[%s3505_s0 + $0x18] sm:$0xff] }
   0x5   :  { %v1815_v17 = vld [vmem:[%s3505_s0 + $0x68] sm:$0xff]  ;;  %v1825_v18 = vld [vmem:[%s3505_s0 + $0xb8] sm:$0xff]  ;;  %v1806_v19 = vld [vmem:[%s3505_s0 + $0x20] sm:$0xff] }
   0x6   :  { %454 = vmatpush.bf16.msra.mxu0 %v446_v6  ;;  %1844 = vmatpush.bf16.msra.mxu1 %v446_v6  ;;  %v1816_v20 = vld [vmem:[%s3505_s0 + $0x70] sm:$0xff]  ;;  %v1826_v21 = vld [vmem:[%s3505_s0 + $0xc0] sm:$0xff]  ;;  %v1807_v22 = vld [vmem:[%s3505_s0 + $0x28] sm:$0xff] }
   0x7   :  { %1845 = vmatpush.bf16.msra.mxu2 %v446_v6  ;;  %1846 = vmatpush.bf16.msra.mxu3 %v446_v6  ;;  %v1817_v23 = vld [vmem:[%s3505_s0 + $0x78] sm:$0xff]  ;;  %v1827_v24 = vld [vmem:[%s3505_s0 + $0xc8] sm:$0xff]  ;;  %v1808_v25 = vld [vmem:[%s3505_s0 + $0x30] sm:$0xff] }
   0x8   :  { %v1818_v26 = vld [vmem:[%s3505_s0 + $0x80] sm:$0xff]  ;;  %v1828_v28 = vld [vmem:[%s3505_s0 + $0xd0] sm:$0xff]  ;;  %v1809_v29 = vld [vmem:[%s3505_s0 + $0x38] sm:$0xff] }
   0x9   :  { %v1834_v27 = vld [vmem:[%s3505_s0 + $0x100] sm:$0xff]  ;;  %v1819_v30 = vld [vmem:[%s3505_s0 + $0x88] sm:$0xff]  ;;  %v1829_v32 = vld [vmem:[%s3505_s0 + $0xd8] sm:$0xff] }
   0xa   :  { %455 = vmatpush.bf16.msra.mxu0 %v1842_v7  ;;  %1847 = vmatpush.bf16.msra.mxu1 %v1842_v7  ;;  %v1835_v31 = vld [vmem:[%s3505_s0 + $0x108] sm:$0xff]  ;;  %v1810_v33 = vld [vmem:[%s3505_s0 + $0x40] sm:$0xff]  ;;  %v1820_v34 = vld [vmem:[%s3505_s0 + $0x90] sm:$0xff] }
   0xb   :  { %1848 = vmatpush.bf16.msra.mxu2 %v1842_v7  ;;  %1849 = vmatpush.bf16.msra.mxu3 %v1842_v7  ;;  %v1836_v37 = vld [vmem:[%s3505_s0 + $0x110] sm:$0xff]  ;;  %v1830_v40 = vld [vmem:[%s3505_s0 + $0xe0] sm:$0xff]  ;;  %v1811_v41 = vld [vmem:[%s3505_s0 + $0x48] sm:$0xff] }
   0xc   :  { %v1821_v42 = vld [vmem:[%s3505_s0 + $0x98] sm:$0xff]  ;;  %v1831_v48 = vld [vmem:[%s3505_s0 + $0xe8] sm:$0xff]  ;;  %v1822_v49 = vld [vmem:[%s3505_s0 + $0xa0] sm:$0xff] }
   0xd   :  { %1761 = vmatmul.msk.bf16.vlgmr.msra.gmra.mxu0 %vm317_vm2, %v1802_v8  ;;  %1771 = vmatmul.msk.bf16.vlgmr.msra.gmra.mxu1 %vm317_vm2, %v1812_v9  ;;  %v1837_v45 = vld [vmem:[%s3505_s0 + $0x118] sm:$0xff]  ;;  %v1838_v53 = vld [vmem:[%s3505_s0 + $0x120] sm:$0xff]  ;;  %v1832_v57 = vld [vmem:[%s3505_s0 + $0xf0] sm:$0xff] }
   0xe   :  { %1782 = vmatmul.msk.bf16.vlgmr.msra.gmra.mxu2 %vm317_vm2, %v1823_v12  ;;  %1793 = vmatmul.msk.bf16.vlgmr.msra.gmra.mxu3 %vm317_vm2, %v1834_v27  ;;  %v1839_v61 = vld [vmem:[%s3505_s0 + $0x128] sm:$0xff]  ;;  %v1833_v1 = vld [vmem:[%s3505_s0 + $0xf8] sm:$0xff]  ;;  %v1840_v5 = vld [vmem:[%s3505_s0 + $0x130] sm:$0xff] }
  0x1d   :  { %1762 = vmatmul.msk.bf16.gmra.mxu0 %vm317_vm2, %v1803_v10  ;;  %1772 = vmatmul.msk.bf16.gmra.mxu1 %vm317_vm2, %v1813_v11  ;;  %v1841_v11 = vld [vmem:[%s3505_s0 + $0x138] sm:$0xff] }
  0x1e   :  { %1783 = vmatmul.msk.bf16.gmra.mxu2 %vm317_vm2, %v1824_v15  ;;  %1794 = vmatmul.msk.bf16.gmra.mxu3 %vm317_vm2, %v1835_v31 }
  0x2d   :  { %1763 = vmatmul.msk.bf16.gmra.mxu0 %vm317_vm2, %v1804_v13  ;;  %1773 = vmatmul.msk.bf16.gmra.mxu1 %vm317_vm2, %v1814_v14 }
  0x2e   :  { %1784 = vmatmul.msk.bf16.gmra.mxu2 %vm317_vm2, %v1825_v18  ;;  %1795 = vmatmul.msk.bf16.gmra.mxu3 %vm317_vm2, %v1836_v37 }
  0x3d   :  { %1764 = vmatmul.msk.bf16.gmra.mxu0 %vm317_vm2, %v1805_v16  ;;  %1774 = vmatmul.msk.bf16.gmra.mxu1 %vm317_vm2, %v1815_v17  ;;  %v98_v17 = vld [vmem:[%s3505_s0 + $0x140] sm:$0xf] }
  0x3e   :  { %1785 = vmatmul.msk.bf16.gmra.mxu2 %vm317_vm2, %v1826_v21  ;;  %1796 = vmatmul.msk.bf16.gmra.mxu3 %vm317_vm2, %v1837_v45  ;;  %v264_v18 = vunpack.c.l.b16 %v98_v17 }
  0x4d   :  { %1765 = vmatmul.msk.bf16.gmra.mxu0 %vm317_vm2, %v1806_v19  ;;  %1775 = vmatmul.msk.bf16.gmra.mxu1 %vm317_vm2, %v1816_v20  ;;  %v305_v19 = vpack.c.b16 %v264_v18, %v264_v18 }
  0x4e   :  { %1786 = vmatmul.msk.bf16.gmra.mxu2 %vm317_vm2, %v1827_v24  ;;  %1797 = vmatmul.msk.bf16.gmra.mxu3 %vm317_vm2, %v1838_v53 }
  0x5d   :  { %1766 = vmatmul.msk.bf16.gmra.mxu0 %vm317_vm2, %v1807_v22  ;;  %1776 = vmatmul.msk.bf16.gmra.mxu1 %vm317_vm2, %v1817_v23 }
  0x5e   :  { %1787 = vmatmul.msk.bf16.gmra.mxu2 %vm317_vm2, %v1828_v28  ;;  %1798 = vmatmul.msk.bf16.gmra.mxu3 %vm317_vm2, %v1839_v61 }
  0x6d   :  { %1767 = vmatmul.msk.bf16.gmra.mxu0 %vm317_vm2, %v1808_v25  ;;  %1777 = vmatmul.msk.bf16.gmra.mxu1 %vm317_vm2, %v1818_v26 }
  0x6e   :  { %1788 = vmatmul.msk.bf16.gmra.mxu2 %vm317_vm2, %v1829_v32  ;;  %1799 = vmatmul.msk.bf16.gmra.mxu3 %vm317_vm2, %v1840_v5 }
  0x7d   :  { %1768 = vmatmul.msk.bf16.gmra.mxu0 %vm317_vm2, %v1809_v29  ;;  %1778 = vmatmul.msk.bf16.gmra.mxu1 %vm317_vm2, %v1819_v30 }
  0x7e   :  { %1789 = vmatmul.msk.bf16.gmra.mxu2 %vm317_vm2, %v1830_v40  ;;  %1800 = vmatmul.msk.bf16.gmra.mxu3 %vm317_vm2, %v1841_v11 }
  0x8a   :  { %v1995_v35 = vpop.f32.mrf.mxu0  ;;  %v1997_v36 = vpop.f32.mrf.mxu1 }
  0x8b   :  { %v829_v28 = vmul.f32 %v1995_v35, %v1995_v35  ;;  %v662_v32 = vsel %vm661_vm3, %v1995_v35, 0.0 }
  0x8d   :  { %1769 = vmatmul.msk.bf16.gmra.mxu0 %vm317_vm2, %v1810_v33  ;;  %1779 = vmatmul.msk.bf16.gmra.mxu1 %vm317_vm2, %v1820_v34 }
  0x8e   :  { %1790 = vmatmul.msk.bf16.gmra.mxu2 %vm317_vm2, %v1831_v48  ;;  %1801 = vmatmul.msk.bf16.gmra.mxu3 %vm317_vm2, %v305_v19 }
  0x91   :  { %v2044_v52 = vpop.f32.mrf.mxu2  ;;  %v2125_v23 = vpop.f32.mrf.mxu3 }
  0x92   :  { %v2005_v38 = vpop.f32.mrf.mxu0  ;;  %v2007_v39 = vpop.f32.mrf.mxu1  ;;  %3595 = vst [vmem:[#allocation4_spill] sm:$0xff] %v2044_v52 }
  0x93   :  { %v830_v26 = vmul.f32 %v2005_v38, %v2005_v38  ;;  %v663_v29 = vsel %vm661_vm3, %v2005_v38, 0.0 }
  0x94   :  { %v664_v40 = vadd.f32 %v663_v29, %v662_v32 }
  0x95   :  { %v911_v33 = vsel %vm661_vm3, %v830_v26, 0.0 }
  0x99   :  { %v2055_v56 = vpop.f32.mrf.mxu2  ;;  %v2133_v27 = vpop.f32.mrf.mxu3 }
  0x9a   :  { %v2019_v43 = vpop.f32.mrf.mxu0  ;;  %v2021_v44 = vpop.f32.mrf.mxu1 }
  0x9b   :  { %v831_v30 = vmul.f32 %v2019_v43, %v2019_v43  ;;  %v665_v34 = vsel %vm661_vm3, %v2019_v43, 0.0 }
  0x9c   :  { %v666_v53 = vadd.f32 %v665_v34, %v664_v40 }
  0x9d   :  { %1770 = vmatmul.msk.bf16.gmra.mxu0 %vm317_vm2, %v1811_v41  ;;  %1780 = vmatmul.msk.bf16.gmra.mxu1 %vm317_vm2, %v1821_v42  ;;  %v910_v41 = vsel %vm661_vm3, %v829_v28, 0.0  ;;  %v913_v42 = vsel %vm661_vm3, %v831_v30, 0.0 }
  0x9e   :  { %1791 = vmatmul.msk.bf16.gmra.mxu2 %vm317_vm2, %v1832_v57 }
  0xa1   :  { %v2065_v60 = vpop.f32.mrf.mxu2  ;;  %v2165_v19 = vpop.f32.mrf.mxu3 }
  0xa2   :  { %v2029_v46 = vpop.f32.mrf.mxu0  ;;  %v2031_v47 = vpop.f32.mrf.mxu1 }
  0xa3   :  { %3593 = vst [vmem:[#allocation2_spill] sm:$0xff] %v2031_v47  ;;  %v832_v37 = vmul.f32 %v2029_v46, %v2029_v46  ;;  %v667_v45 = vsel %vm661_vm3, %v2029_v46, 0.0 }
  0xa4   :  { %v668_v17 = vadd.f32 %v667_v45, %v666_v53 }
  0xa5   :  { %v915_v61 = vsel %vm661_vm3, %v832_v37, 0.0 }
  0xa9   :  { %v2075_v0 = vpop.f32.mrf.mxu2 }
  0xaa   :  { %v2040_v50 = vpop.f32.mrf.mxu0  ;;  %v2042_v51 = vpop.f32.mrf.mxu1 }
  0xab   :  { %3594 = vst [vmem:[#allocation3_spill] sm:$0xff] %v2042_v51  ;;  %v833_v48 = vmul.f32 %v2040_v50, %v2040_v50 }
  0xad   :  { %1781 = vmatmul.msk.bf16.gmra.mxu1 %vm317_vm2, %v1822_v49  ;;  %v912_v49 = vadd.f32 %v911_v33, %v910_v41  ;;  %v917_v26 = vsel %vm661_vm3, %v833_v48, 0.0 }
  0xae   :  { %1792 = vmatmul.msk.bf16.gmra.mxu2 %vm317_vm2, %v1833_v1  ;;  %v669_v1 = vsel %vm661_vm3, %v2040_v50, 0.0 }
  0xaf   :  { %v914_v11 = vadd.f32 %v913_v42, %v912_v49  ;;  %v670_v32 = vadd.f32 %v669_v1, %v668_v17 }
  0xb1   :  { %v2085_v4 = vpop.f32.mrf.mxu2  ;;  %v916_v30 = vadd.f32 %v915_v61, %v914_v11 }
  0xb2   :  { %v2051_v54 = vpop.f32.mrf.mxu0  ;;  %v2053_v55 = vpop.f32.mrf.mxu1  ;;  %3600 = vst [vmem:[#allocation9_spill] sm:$0xff] %v2085_v4 }
  0xb3   :  { %v834_v5 = vmul.f32 %v2051_v54, %v2051_v54  ;;  %v671_v28 = vsel %vm661_vm3, %v2051_v54, 0.0  ;;  %v918_v40 = vadd.f32 %v917_v26, %v916_v30 }
  0xb4   :  { %v672_v41 = vadd.f32 %v671_v28, %v670_v32 }
  0xb5   :  { %v919_v33 = vsel %vm661_vm3, %v834_v5, 0.0 }
  0xb6   :  { %v920_v53 = vadd.f32 %v919_v33, %v918_v40 }
  0xb9   :  { %v2095_v8 = vpop.f32.mrf.mxu2 }
  0xba   :  { %v2061_v58 = vpop.f32.mrf.mxu0  ;;  %v2063_v59 = vpop.f32.mrf.mxu1  ;;  %3603 = vst [vmem:[#allocation12_spill] sm:$0xff] %v2095_v8 }
  0xbb   :  { %3596 = vst [vmem:[#allocation5_spill] sm:$0xff] %v2063_v59  ;;  %v835_v29 = vmul.f32 %v2061_v58, %v2061_v58  ;;  %v673_v34 = vsel %vm661_vm3, %v2061_v58, 0.0 }
  0xbc   :  { %v674_v61 = vadd.f32 %v673_v34, %v672_v41 }
  0xbd   :  { %v921_v45 = vsel %vm661_vm3, %v835_v29, 0.0  ;;  %v2191_v29 = vpop.f32.mrf.mxu3 }
  0xbe   :  { %v922_v26 = vadd.f32 %v921_v45, %v920_v53 }
  0xc1   :  { %v2104_v12 = vpop.f32.mrf.mxu2 }
  0xc2   :  { %v2071_v62 = vpop.f32.mrf.mxu0  ;;  %v2073_v63 = vpop.f32.mrf.mxu1  ;;  %3605 = vst [vmem:[#allocation14_spill] sm:$0xff] %v2104_v12 }
  0xc3   :  { %3597 = vst [vmem:[#allocation6_spill] sm:$0xff] %v2071_v62  ;;  %v836_v37 = vmul.f32 %v2071_v62, %v2071_v62  ;;  %v675_v48 = vsel %vm661_vm3, %v2071_v62, 0.0 }
  0xc4   :  { %v676_v28 = vadd.f32 %v675_v48, %v674_v61 }
  0xc5   :  { %v923_v5 = vsel %vm661_vm3, %v836_v37, 0.0 }
  0xc6   :  { %v924_v34 = vadd.f32 %v923_v5, %v922_v26 }
  0xc9   :  { %v2113_v16 = vpop.f32.mrf.mxu2 }
  0xca   :  { %v2081_v2 = vpop.f32.mrf.mxu0  ;;  %v2083_v3 = vpop.f32.mrf.mxu1  ;;  %3609 = vst [vmem:[#allocation18_spill] sm:$0xff] %v2113_v16 }
  0xcb   :  { %3598 = vst [vmem:[#allocation7_spill] sm:$0xff] %v2081_v2  ;;  %v837_v49 = vmul.f32 %v2081_v2, %v2081_v2  ;;  %v677_v11 = vsel %vm661_vm3, %v2081_v2, 0.0 }
  0xcc   :  { %3599 = vst [vmem:[#allocation8_spill] sm:$0xff] %v2083_v3  ;;  %v678_v37 = vadd.f32 %v677_v11, %v676_v28 }
  0xcd   :  { %v925_v30 = vsel %vm661_vm3, %v837_v49, 0.0 }
  0xce   :  { %v926_v53 = vadd.f32 %v925_v30, %v924_v34 }
  0xd1   :  { %v2123_v22 = vpop.f32.mrf.mxu2 }
  0xd2   :  { %v2091_v6 = vpop.f32.mrf.mxu0  ;;  %v2093_v7 = vpop.f32.mrf.mxu1  ;;  %3612 = vst [vmem:[#allocation21_spill] sm:$0xff] %v2123_v22 }
  0xd3   :  { %3601 = vst [vmem:[#allocation10_spill] sm:$0xff] %v2091_v6  ;;  %v838_v17 = vmul.f32 %v2091_v6, %v2091_v6  ;;  %v679_v32 = vsel %vm661_vm3, %v2091_v6, 0.0 }
  0xd4   :  { %3602 = vst [vmem:[#allocation11_spill] sm:$0xff] %v2093_v7  ;;  %v680_v49 = vadd.f32 %v679_v32, %v678_v37  ;;  %v2219_v37 = vpop.f32.mrf.mxu3 }
  0xd5   :  { %v927_v41 = vsel %vm661_vm3, %v838_v17, 0.0 }
  0xd6   :  { %v928_v11 = vadd.f32 %v927_v41, %v926_v53 }
  0xd9   :  { %v2141_v31 = vpop.f32.mrf.mxu2 }
  0xda   :  { %v2097_v9 = vpop.f32.mrf.mxu0  ;;  %v2099_v10 = vpop.f32.mrf.mxu1  ;;  %3614 = vst [vmem:[#allocation23_spill] sm:$0xff] %v2141_v31 }
  0xdb   :  { %3604 = vst [vmem:[#allocation13_spill] sm:$0xff] %v2097_v9  ;;  %v839_v33 = vmul.f32 %v2097_v9, %v2097_v9  ;;  %v681_v45 = vsel %vm661_vm3, %v2097_v9, 0.0 }
  0xdc   :  { %v682_v26 = vadd.f32 %v681_v45, %v680_v49 }
  0xdd   :  { %v929_v61 = vsel %vm661_vm3, %v839_v33, 0.0 }
  0xde   :  { %v930_v33 = vadd.f32 %v929_v61, %v928_v11 }
  0xe1   :  { %v2177_v42 = vpop.f32.mrf.mxu2 }
  0xe2   :  { %v2107_v13 = vpop.f32.mrf.mxu0  ;;  %v2109_v14 = vpop.f32.mrf.mxu1  ;;  %3617 = vst [vmem:[#allocation26_spill] sm:$0xff] %v2177_v42 }
  0xe3   :  { %3606 = vst [vmem:[#allocation15_spill] sm:$0xff] %v2107_v13  ;;  %v840_v48 = vmul.f32 %v2107_v13, %v2107_v13  ;;  %v683_v6 = vsel %vm661_vm3, %v2107_v13, 0.0 }
  0xe4   :  { %3607 = vst [vmem:[#allocation16_spill] sm:$0xff] %v2109_v14  ;;  %v684_v34 = vadd.f32 %v683_v6, %v682_v26 }
  0xe5   :  { %v931_v9 = vsel %vm661_vm3, %v840_v48, 0.0 }
  0xe6   :  { %v932_v53 = vadd.f32 %v931_v9, %v930_v33 }
  0xe9   :  { %v2212_v17 = vpop.f32.mrf.mxu2 }
  0xea   :  { %v2111_v15 = vpop.f32.mrf.mxu0  ;;  %v2118_v20 = vpop.f32.mrf.mxu1  ;;  %3621 = vst [vmem:[#allocation30_spill] sm:$0xff] %v2212_v17 }
  0xeb   :  { %3608 = vst [vmem:[#allocation17_spill] sm:$0xff] %v2111_v15  ;;  %v841_v5 = vmul.f32 %v2111_v15, %v2111_v15  ;;  %v685_v30 = vsel %vm661_vm3, %v2111_v15, 0.0 }
  0xec   :  { %3610 = vst [vmem:[#allocation19_spill] sm:$0xff] %v2118_v20  ;;  %v686_v48 = vadd.f32 %v685_v30, %v684_v34 }
  0xed   :  { %v933_v13 = vsel %vm661_vm3, %v841_v5, 0.0 }
  0xee   :  { %v934_v61 = vadd.f32 %v933_v13, %v932_v53 }
  0xf2   :  { %v2121_v21 = vpop.f32.mrf.mxu0  ;;  %v2129_v25 = vpop.f32.mrf.mxu1 }
  0xf3   :  { %3611 = vst [vmem:[#allocation20_spill] sm:$0xff] %v2121_v21  ;;  %v842_v32 = vmul.f32 %v2121_v21, %v2121_v21  ;;  %v687_v41 = vsel %vm661_vm3, %v2121_v21, 0.0 }
  0xf4   :  { %v688_v11 = vadd.f32 %v687_v41, %v686_v48  ;;  %v2245_v48 = vpop.f32.mrf.mxu2 }
  0xf5   :  { %v935_v49 = vsel %vm661_vm3, %v842_v32, 0.0  ;;  %3623 = vst [vmem:[#allocation32_spill] sm:$0xff] %v2245_v48 }
  0xf6   :  { %v936_v30 = vadd.f32 %v935_v49, %v934_v61 }
  0xfa   :  { %v2127_v24 = vpop.f32.mrf.mxu0  ;;  %v2163_v18 = vpop.f32.mrf.mxu1 }
  0xfb   :  { %3613 = vst [vmem:[#allocation22_spill] sm:$0xff] %v2127_v24  ;;  %v843_v45 = vmul.f32 %v2127_v24, %v2127_v24  ;;  %v689_v15 = vsel %vm661_vm3, %v2127_v24, 0.0 }
  0xfc   :  { %3616 = vst [vmem:[#allocation25_spill] sm:$0xff] %v2163_v18  ;;  %v690_v32 = vadd.f32 %v689_v15, %v688_v11 }
  0xfd   :  { %v937_v5 = vsel %vm661_vm3, %v843_v45, 0.0 }
  0xfe   :  { %v938_v53 = vadd.f32 %v937_v5, %v936_v30 }
 0x102   :  { %v2156_v57 = vpop.f32.mrf.mxu0  ;;  %v2198_v40 = vpop.f32.mrf.mxu1 }
 0x103   :  { %3615 = vst [vmem:[#allocation24_spill] sm:$0xff] %v2156_v57  ;;  %v844_v6 = vmul.f32 %v2156_v57, %v2156_v57  ;;  %v691_v21 = vsel %vm661_vm3, %v2156_v57, 0.0  ;;  %v2247_v57 = vpop.f32.mrf.mxu3 }
 0x104   :  { %3619 = vst [vmem:[#allocation28_spill] sm:$0xff] %v2198_v40  ;;  %v692_v45 = vadd.f32 %v691_v21, %v690_v32 }
 0x105   :  { %v939_v34 = vsel %vm661_vm3, %v844_v6, 0.0 }
 0x106   :  { %v940_v6 = vadd.f32 %v939_v34, %v938_v53 }
 0x10a   :  { %v2184_v1 = vpop.f32.mrf.mxu0  ;;  %v2231_v26 = vpop.f32.mrf.mxu1 }
 0x10b   :  { %3618 = vst [vmem:[#allocation27_spill] sm:$0xff] %v2184_v1  ;;  %v845_v9 = vmul.f32 %v2184_v1, %v2184_v1  ;;  %v693_v13 = vsel %vm661_vm3, %v2184_v1, 0.0  ;;  %v2268_v53 = vpop.f32.mrf.mxu3 }
 0x10c   :  { %3622 = vst [vmem:[#allocation31_spill] sm:$0xff] %v2231_v26  ;;  %v694_v61 = vadd.f32 %v693_v13, %v692_v45  ;;  %v701_v45 = vsel %vm661_vm3, %v1997_v36, 0.0 }
 0x10d   :  { %v941_v24 = vsel %vm661_vm3, %v845_v9, 0.0 }
 0x10e   :  { %v942_v21 = vadd.f32 %v941_v24, %v940_v6 }
 0x112   :  { %v2210_v28 = vpop.f32.mrf.mxu0  ;;  %v2260_v62 = vpop.f32.mrf.mxu1 }
 0x113   :  { %3620 = vst [vmem:[#allocation29_spill] sm:$0xff] %v2210_v28  ;;  %v846_v41 = vmul.f32 %v2210_v28, %v2210_v28  ;;  %v695_v15 = vsel %vm661_vm3, %v2210_v28, 0.0  ;;  %v849_v28 = vmul.f32 %v1997_v36, %v1997_v36 }
 0x114   :  { %v696_v30 = vadd.f32 %v695_v15, %v694_v61  ;;  %v850_v15 = vmul.f32 %v2007_v39, %v2007_v39 }
 0x115   :  { %v943_v11 = vsel %vm661_vm3, %v846_v41, 0.0 }
 0x116   :  { %v944_v1 = vadd.f32 %v943_v11, %v942_v21  ;;  %v2275_v11 = vpop.f32.mrf.mxu2 }
 0x117   :  { %3624 = vst [vmem:[#allocation33_spill] sm:$0xff] %v2275_v11 }
 0x11a   :  { %v2238_v33 = vpop.f32.mrf.mxu0 }
 0x11b   :  { %v847_v49 = vmul.f32 %v2238_v33, %v2238_v33  ;;  %v697_v5 = vsel %vm661_vm3, %v2238_v33, 0.0 }
 0x11c   :  { %v698_v2 = vadd.f32 %v697_v5, %v696_v30  ;;  %v949_v5 = vsel %vm661_vm3, %v849_v28, 0.0 }
 0x11d   :  { %v945_v32 = vsel %vm661_vm3, %v847_v49, 0.0 }
 0x11e   :  { %v946_v41 = vadd.f32 %v945_v32, %v944_v1  ;;  %v703_v1 = vsel %vm661_vm3, %v2007_v39, 0.0  ;;  %v951_v32 = vsel %vm661_vm3, %v850_v15, 0.0  ;;  %v2294_v15 = vpop.f32.mrf.mxu3 }
 0x122   :  { %v2258_v9 = vpop.f32.mrf.mxu0 }
 0x123   :  { %v699_v34 = vsel %vm661_vm3, %v2258_v9, 0.0  ;;  %v848_v13 = vmul.f32 %v2258_v9, %v2258_v9 }
 0x124   :  { %v700_v24 = vadd.f32 %v699_v34, %v698_v2  ;;  %v851_v2 = vmul.f32 %v2021_v44, %v2021_v44  ;;  %v705_v34 = vsel %vm661_vm3, %v2021_v44, 0.0 }
 0x125   :  { %v947_v49 = vsel %vm661_vm3, %v848_v13, 0.0  ;;  %v852_v13 = vmul.f32 %v2031_v47, %v2031_v47 }
 0x126   :  { %v702_v6 = vadd.f32 %v701_v45, %v700_v24  ;;  %v948_v61 = vadd.f32 %v947_v49, %v946_v41  ;;  %v953_v28 = vsel %vm661_vm3, %v851_v2, 0.0  ;;  %v707_v45 = vsel %vm661_vm3, %v2031_v47, 0.0  ;;  %v2306_v47 = vpop.f32.mrf.mxu2 }
 0x127   :  { %v853_v49 = vmul.f32 %v2042_v51, %v2042_v51  ;;  %v854_v2 = vmul.f32 %v2053_v55, %v2053_v55  ;;  %3625 = vst [vmem:[#allocation34_spill] sm:$0xff] %v2306_v47 }
 0x128   :  { %v704_v21 = vadd.f32 %v703_v1, %v702_v6  ;;  %v950_v30 = vadd.f32 %v949_v5, %v948_v61  ;;  %v2292_v5 = vpop.f32.mrf.mxu1  ;;  %v955_v1 = vsel %vm661_vm3, %v852_v13, 0.0 }
 0x129   :  { %v959_v13 = vsel %vm661_vm3, %v854_v2, 0.0 }
 0x12a   :  { %v706_v41 = vadd.f32 %v705_v34, %v704_v21  ;;  %v952_v24 = vadd.f32 %v951_v32, %v950_v30  ;;  %v709_v21 = vsel %vm661_vm3, %v2042_v51, 0.0  ;;  %v957_v34 = vsel %vm661_vm3, %v853_v49, 0.0 }
 0x12b   :  { %v713_v51 = vsel %vm661_vm3, %v2063_v59, 0.0 }
 0x12c   :  { %v708_v6 = vadd.f32 %v707_v45, %v706_v41  ;;  %v954_v61 = vadd.f32 %v953_v28, %v952_v24  ;;  %v711_v41 = vsel %vm661_vm3, %v2053_v55, 0.0  ;;  %v855_v24 = vmul.f32 %v2063_v59, %v2063_v59 }
 0x12d   :  { %v717_v59 = vsel %vm661_vm3, %v2083_v3, 0.0 }
 0x12e   :  { %v710_v30 = vadd.f32 %v709_v21, %v708_v6  ;;  %v956_v32 = vadd.f32 %v955_v1, %v954_v61  ;;  %v856_v6 = vmul.f32 %v2073_v63, %v2073_v63  ;;  %v961_v1 = vsel %vm661_vm3, %v855_v24, 0.0 }
 0x12f   :  { %v715_v21 = vsel %vm661_vm3, %v2073_v63, 0.0 }
 0x130   :  { %v712_v28 = vadd.f32 %v711_v41, %v710_v30  ;;  %v958_v45 = vadd.f32 %v957_v34, %v956_v32  ;;  %v857_v30 = vmul.f32 %v2083_v3, %v2083_v3  ;;  %v2318_v41 = vpop.f32.mrf.mxu3  ;;  %v963_v2 = vsel %vm661_vm3, %v856_v6, 0.0 }
 0x131   :  { %v721_v3 = vsel %vm661_vm3, %v2099_v10, 0.0 }
 0x132   :  { %v714_v61 = vadd.f32 %v713_v51, %v712_v28  ;;  %v960_v49 = vadd.f32 %v959_v13, %v958_v45  ;;  %v858_v51 = vmul.f32 %v2093_v7, %v2093_v7  ;;  %v2325_v45 = vpop.f32.mrf.mxu1  ;;  %v965_v13 = vsel %vm661_vm3, %v857_v30, 0.0 }
 0x133   :  { %3626 = vst [vmem:[#allocation35_spill] sm:$0xff] %v2325_v45 }
 0x134   :  { %v716_v32 = vadd.f32 %v715_v21, %v714_v61  ;;  %v962_v34 = vadd.f32 %v961_v1, %v960_v49  ;;  %v719_v61 = vsel %vm661_vm3, %v2093_v7, 0.0  ;;  %v859_v49 = vmul.f32 %v2099_v10, %v2099_v10 }
 0x135   :  { %v967_v21 = vsel %vm661_vm3, %v858_v51, 0.0  ;;  %v723_v7 = vsel %vm661_vm3, %v2109_v14, 0.0 }
 0x136   :  { %v718_v28 = vadd.f32 %v717_v59, %v716_v32  ;;  %v964_v24 = vadd.f32 %v963_v2, %v962_v34  ;;  %v860_v59 = vmul.f32 %v2109_v14, %v2109_v14  ;;  %v2337_v2 = vpop.f32.mrf.mxu2  ;;  %v969_v30 = vsel %vm661_vm3, %v859_v49, 0.0 }
 0x137   :  { %3627 = vst [vmem:[#allocation36_spill] sm:$0xff] %v2337_v2  ;;  %v727_v14 = vsel %vm661_vm3, %v2129_v25, 0.0 }
 0x138   :  { %v966_v1 = vadd.f32 %v965_v13, %v964_v24  ;;  %v720_v6 = vadd.f32 %v719_v61, %v718_v28  ;;  %v861_v28 = vmul.f32 %v2118_v20, %v2118_v20  ;;  %v2344_v13 = vpop.f32.mrf.mxu3  ;;  %v971_v61 = vsel %vm661_vm3, %v860_v59, 0.0 }
 0x13a   :  { %v722_v32 = vadd.f32 %v721_v3, %v720_v6  ;;  %v968_v34 = vadd.f32 %v967_v21, %v966_v1  ;;  %v725_v3 = vsel %vm661_vm3, %v2118_v20, 0.0  ;;  %v862_v1 = vmul.f32 %v2129_v25, %v2129_v25 }
 0x13b   :  { %v973_v21 = vsel %vm661_vm3, %v861_v28, 0.0  ;;  %v729_v20 = vsel %vm661_vm3, %v2163_v18, 0.0 }
 0x13c   :  { %v724_v24 = vadd.f32 %v723_v7, %v722_v32  ;;  %v970_v51 = vadd.f32 %v969_v30, %v968_v34  ;;  %v863_v7 = vmul.f32 %v2163_v18, %v2163_v18  ;;  %v2356_v30 = vpop.f32.mrf.mxu1  ;;  %v975_v59 = vsel %vm661_vm3, %v862_v1, 0.0 }
 0x13d   :  { %3628 = vst [vmem:[#allocation37_spill] sm:$0xff] %v2356_v30 }
 0x13e   :  { %v726_v6 = vadd.f32 %v725_v3, %v724_v24  ;;  %v972_v49 = vadd.f32 %v971_v61, %v970_v51  ;;  %v864_v24 = vmul.f32 %v2198_v40, %v2198_v40  ;;  %v977_v61 = vsel %vm661_vm3, %v863_v7, 0.0 }
 0x13f   :  { %v731_v3 = vsel %vm661_vm3, %v2198_v40, 0.0  ;;  %v866_v7 = vmul.f32 %v2260_v62, %v2260_v62  ;;  %v868_v40 = vmul.f32 %v2325_v45, %v2325_v45 }
 0x140   :  { %v728_v32 = vadd.f32 %v727_v14, %v726_v6  ;;  %v974_v34 = vadd.f32 %v973_v21, %v972_v49  ;;  %v865_v14 = vmul.f32 %v2231_v26, %v2231_v26  ;;  %v2368_v21 = vpop.f32.mrf.mxu2  ;;  %v2370_v1 = vpop.f32.mrf.mxu3  ;;  %v979_v18 = vsel %vm661_vm3, %v864_v24, 0.0 }
 0x141   :  { %3629 = vst [vmem:[#allocation38_spill] sm:$0xff] %v2368_v21  ;;  %v983_v24 = vsel %vm661_vm3, %v866_v7, 0.0 }
 0x142   :  { %v730_v51 = vadd.f32 %v729_v20, %v728_v32  ;;  %v976_v28 = vadd.f32 %v975_v59, %v974_v34  ;;  %v733_v20 = vsel %vm661_vm3, %v2231_v26, 0.0  ;;  %v981_v59 = vsel %vm661_vm3, %v865_v14, 0.0 }
 0x143   :  { %v737_v26 = vsel %vm661_vm3, %v2292_v5, 0.0 }
 0x144   :  { %v732_v6 = vadd.f32 %v731_v3, %v730_v51  ;;  %v978_v49 = vadd.f32 %v977_v61, %v976_v28  ;;  %v735_v51 = vsel %vm661_vm3, %v2260_v62, 0.0  ;;  %v867_v28 = vmul.f32 %v2292_v5, %v2292_v5 }
 0x146   :  { %v734_v32 = vadd.f32 %v733_v20, %v732_v6  ;;  %v980_v34 = vadd.f32 %v979_v18, %v978_v49  ;;  %v2387_v49 = vpop.f32.mrf.mxu1  ;;  %v985_v14 = vsel %vm661_vm3, %v867_v28, 0.0  ;;  %v739_v20 = vsel %vm661_vm3, %v2325_v45, 0.0 }
 0x147   :  { %3630 = vst [vmem:[#allocation39_spill] sm:$0xff] %v2387_v49  ;;  %v871_v45 = vmul.f32 %v2044_v52, %v2044_v52 }
 0x148   :  { %v736_v61 = vadd.f32 %v735_v51, %v734_v32  ;;  %v982_v3 = vadd.f32 %v981_v59, %v980_v34  ;;  %v869_v32 = vmul.f32 %v2356_v30, %v2356_v30  ;;  %v2394_v59 = vpop.f32.mrf.mxu3  ;;  %v987_v51 = vsel %vm661_vm3, %v868_v40, 0.0 }
 0x14a   :  { %v984_v6 = vadd.f32 %v983_v24, %v982_v3  ;;  %v738_v18 = vadd.f32 %v737_v26, %v736_v61  ;;  %v741_v3 = vsel %vm661_vm3, %v2356_v30, 0.0  ;;  %v870_v26 = vmul.f32 %v2387_v49, %v2387_v49  ;;  %v2401_v24 = vpop.f32.mrf.mxu2 }
 0x14b   :  { %3631 = vst [vmem:[#allocation40_spill] sm:$0xff] %v2401_v24  ;;  %v872_v30 = vmul.f32 %v2055_v56, %v2055_v56 }
 0x14c   :  { %v986_v34 = vadd.f32 %v985_v14, %v984_v6  ;;  %v740_v7 = vadd.f32 %v739_v20, %v738_v18  ;;  %v989_v6 = vsel %vm661_vm3, %v869_v32, 0.0  ;;  %v743_v18 = vsel %vm661_vm3, %v2387_v49, 0.0 }
 0x14d   :  { %v745_v20 = vsel %vm661_vm3, %v2044_v52, 0.0  ;;  %v747_v32 = vsel %vm661_vm3, %v2055_v56, 0.0  ;;  %v873_v49 = vmul.f32 %v2065_v60, %v2065_v60  ;;  %v749_v52 = vsel %vm661_vm3, %v2065_v60, 0.0 }
 0x14e   :  { %v988_v61 = vadd.f32 %v987_v51, %v986_v34  ;;  %v742_v28 = vadd.f32 %v741_v3, %v740_v7  ;;  %v991_v34 = vsel %vm661_vm3, %v870_v26, 0.0  ;;  %v993_v3 = vsel %vm661_vm3, %v871_v45, 0.0 }
 0x14f   :  { %v874_v26 = vmul.f32 %v2075_v0, %v2075_v0 }
 0x150   :  { %v990_v14 = vadd.f32 %v989_v6, %v988_v61  ;;  %v744_v40 = vadd.f32 %v743_v18, %v742_v28  ;;  %v2418_v6 = vpop.f32.mrf.mxu3  ;;  %v995_v18 = vsel %vm661_vm3, %v872_v30, 0.0 }
 0x151   :  { %v999_v30 = vsel %vm661_vm3, %v874_v26, 0.0 }
 0x152   :  { %v746_v7 = vadd.f32 %v745_v20, %v744_v40  ;;  %v992_v51 = vadd.f32 %v991_v34, %v990_v14  ;;  %v997_v40 = vsel %vm661_vm3, %v873_v49, 0.0  ;;  %v751_v20 = vsel %vm661_vm3, %v2075_v0, 0.0 }
 0x153   :  { %v875_v34 = vmul.f32 %v2085_v4, %v2085_v4 }
 0x154   :  { %v748_v61 = vadd.f32 %v747_v32, %v746_v7  ;;  %v994_v28 = vadd.f32 %v993_v3, %v992_v51  ;;  %v2430_v3 = vpop.f32.mrf.mxu2  ;;  %v753_v32 = vsel %vm661_vm3, %v2085_v4, 0.0  ;;  %v757_v4 = vsel %vm661_vm3, %v2104_v12, 0.0 }
 0x155   :  { %3632 = vst [vmem:[#allocation41_spill] sm:$0xff] %v2430_v3 }
 0x156   :  { %v750_v14 = vadd.f32 %v749_v52, %v748_v61  ;;  %v996_v45 = vadd.f32 %v995_v18, %v994_v28  ;;  %v876_v52 = vmul.f32 %v2095_v8, %v2095_v8  ;;  %v1001_v28 = vsel %vm661_vm3, %v875_v34, 0.0 }
 0x157   :  { %v755_v18 = vsel %vm661_vm3, %v2095_v8, 0.0 }
 0x158   :  { %v752_v7 = vadd.f32 %v751_v20, %v750_v14  ;;  %v998_v51 = vadd.f32 %v997_v40, %v996_v45  ;;  %v877_v14 = vmul.f32 %v2104_v12, %v2104_v12  ;;  %v2442_v20 = vpop.f32.mrf.mxu3  ;;  %v1003_v26 = vsel %vm661_vm3, %v876_v52, 0.0 }
 0x159   :  { %v880_v12 = vmul.f32 %v2141_v31, %v2141_v31 }
 0x15a   :  { %v754_v61 = vadd.f32 %v753_v32, %v752_v7  ;;  %v1000_v49 = vadd.f32 %v999_v30, %v998_v51  ;;  %v878_v7 = vmul.f32 %v2113_v16, %v2113_v16  ;;  %v1005_v30 = vsel %vm661_vm3, %v877_v14, 0.0 }
 0x15b   :  { %v759_v32 = vsel %vm661_vm3, %v2113_v16, 0.0 }
 0x15c   :  { %v756_v45 = vadd.f32 %v755_v18, %v754_v61  ;;  %v1002_v40 = vadd.f32 %v1001_v28, %v1000_v49  ;;  %v879_v61 = vmul.f32 %v2123_v22, %v2123_v22  ;;  %v1007_v52 = vsel %vm661_vm3, %v878_v7, 0.0 }
 0x15d   :  { %v761_v18 = vsel %vm661_vm3, %v2123_v22, 0.0 }
 0x15e   :  { %v758_v51 = vadd.f32 %v757_v4, %v756_v45  ;;  %v1004_v34 = vadd.f32 %v1003_v26, %v1002_v40  ;;  %v2459_v40 = vpop.f32.mrf.mxu2  ;;  %v1009_v14 = vsel %vm661_vm3, %v879_v61, 0.0  ;;  %v763_v26 = vsel %vm661_vm3, %v2141_v31, 0.0 }
 0x15f   :  { %3633 = vst [vmem:[#allocation42_spill] sm:$0xff] %v2459_v40  ;;  %v767_v31 = vsel %vm661_vm3, %v2212_v17, 0.0 }
 0x160   :  { %v760_v49 = vadd.f32 %v759_v32, %v758_v51  ;;  %v1006_v28 = vadd.f32 %v1005_v30, %v1004_v34  ;;  %v881_v51 = vmul.f32 %v2177_v42, %v2177_v42  ;;  %v2466_v30 = vpop.f32.mrf.mxu3  ;;  %v1011_v32 = vsel %vm661_vm3, %v880_v12, 0.0 }
 0x162   :  { %v1008_v4 = vadd.f32 %v1007_v52, %v1006_v28  ;;  %v762_v45 = vadd.f32 %v761_v18, %v760_v49  ;;  %v765_v28 = vsel %vm661_vm3, %v2177_v42, 0.0  ;;  %v882_v49 = vmul.f32 %v2212_v17, %v2212_v17 }
 0x163   :  { %v1013_v18 = vsel %vm661_vm3, %v881_v51, 0.0  ;;  %v884_v42 = vmul.f32 %v2275_v11, %v2275_v11 }
 0x164   :  { %v764_v34 = vadd.f32 %v763_v26, %v762_v45  ;;  %v1010_v7 = vadd.f32 %v1009_v14, %v1008_v4  ;;  %v883_v4 = vmul.f32 %v2245_v48, %v2245_v48  ;;  %v1015_v12 = vsel %vm661_vm3, %v882_v49, 0.0 }
 0x165   :  { %v769_v26 = vsel %vm661_vm3, %v2245_v48, 0.0 }
 0x166   :  { %v766_v52 = vadd.f32 %v765_v28, %v764_v34  ;;  %v1012_v61 = vadd.f32 %v1011_v32, %v1010_v7  ;;  %v1017_v51 = vsel %vm661_vm3, %v883_v4, 0.0  ;;  %v771_v32 = vsel %vm661_vm3, %v2275_v11, 0.0 }
 0x167   :  { %v885_v28 = vmul.f32 %v2306_v47, %v2306_v47  ;;  %v886_v4 = vmul.f32 %v2337_v2, %v2337_v2  ;;  %v888_v11 = vmul.f32 %v2401_v24, %v2401_v24 }
 0x168   :  { %v768_v45 = vadd.f32 %v767_v31, %v766_v52  ;;  %v1014_v14 = vadd.f32 %v1013_v18, %v1012_v61  ;;  %v2488_v61 = vpop.f32.mrf.mxu2  ;;  %v2490_v49 = vpop.f32.mrf.mxu3  ;;  %v1019_v18 = vsel %vm661_vm3, %v884_v42, 0.0 }
 0x169   :  { %3634 = vst [vmem:[#allocation43_spill] sm:$0xff] %v2488_v61  ;;  %v1023_v42 = vsel %vm661_vm3, %v886_v4, 0.0  ;;  %v1027_v4 = vsel %vm661_vm3, %v888_v11, 0.0 }
 0x16a   :  { %v770_v34 = vadd.f32 %v769_v26, %v768_v45  ;;  %v1016_v7 = vadd.f32 %v1015_v12, %v1014_v14  ;;  %v773_v45 = vsel %vm661_vm3, %v2306_v47, 0.0  ;;  %v1021_v26 = vsel %vm661_vm3, %v885_v28, 0.0 }
 0x16b   :  { %v777_v47 = vsel %vm661_vm3, %v2368_v21, 0.0 }
 0x16c   :  { %v772_v31 = vadd.f32 %v771_v32, %v770_v34  ;;  %v1018_v52 = vadd.f32 %v1017_v51, %v1016_v7  ;;  %v775_v34 = vsel %vm661_vm3, %v2337_v2, 0.0  ;;  %v887_v7 = vmul.f32 %v2368_v21, %v2368_v21 }
 0x16e   :  { %v774_v14 = vadd.f32 %v773_v45, %v772_v31  ;;  %v1020_v12 = vadd.f32 %v1019_v18, %v1018_v52  ;;  %v1025_v28 = vsel %vm661_vm3, %v887_v7, 0.0  ;;  %v779_v18 = vsel %vm661_vm3, %v2401_v24, 0.0 }
 0x16f   :  { %v889_v45 = vmul.f32 %v2430_v3, %v2430_v3 }
 0x170   :  { %v776_v51 = vadd.f32 %v775_v34, %v774_v14  ;;  %v1022_v32 = vadd.f32 %v1021_v26, %v1020_v12  ;;  %v2512_v26 = vpop.f32.mrf.mxu3  ;;  %v781_v34 = vsel %vm661_vm3, %v2430_v3, 0.0  ;;  %v785_v3 = vsel %vm661_vm3, %v2488_v61, 0.0 }
 0x172   :  { %v778_v31 = vadd.f32 %v777_v47, %v776_v51  ;;  %v1024_v52 = vadd.f32 %v1023_v42, %v1022_v32  ;;  %v890_v47 = vmul.f32 %v2459_v40, %v2459_v40  ;;  %v2519_v32 = vpop.f32.mrf.mxu2  ;;  %v1029_v42 = vsel %vm661_vm3, %v889_v45, 0.0 }
 0x173   :  { %v893_v45 = vmul.f32 %v2125_v23, %v2125_v23 }
 0x174   :  { %v1026_v14 = vadd.f32 %v1025_v28, %v1024_v52  ;;  %v780_v12 = vadd.f32 %v779_v18, %v778_v31  ;;  %v783_v52 = vsel %vm661_vm3, %v2459_v40, 0.0  ;;  %v891_v31 = vmul.f32 %v2488_v61, %v2488_v61 }
 0x175   :  { %v1031_v18 = vsel %vm661_vm3, %v890_v47, 0.0  ;;  %v787_v40 = vsel %vm661_vm3, %v2519_v32, 0.0  ;;  %v789_v47 = vsel %vm661_vm3, %v2125_v23, 0.0 }
 0x176   :  { %v1028_v51 = vadd.f32 %v1027_v4, %v1026_v14  ;;  %v782_v7 = vadd.f32 %v781_v34, %v780_v12  ;;  %v892_v14 = vmul.f32 %v2519_v32, %v2519_v32  ;;  %v1033_v34 = vsel %vm661_vm3, %v891_v31, 0.0 }
 0x177   :  { %v791_v31 = vsel %vm661_vm3, %v2133_v27, 0.0 }
 0x178   :  { %v1030_v28 = vadd.f32 %v1029_v42, %v1028_v51  ;;  %v784_v11 = vadd.f32 %v783_v52, %v782_v7  ;;  %v659_v42 = vpop.f32.mrf.mxu3  ;;  %v894_v52 = vmul.f32 %v2133_v27, %v2133_v27 }
 0x179   :  { %v793_v42 = vsel %vm661_vm3, %v2165_v19, 0.0 }
 0x17a   :  { %v1032_v12 = vadd.f32 %v1031_v18, %v1030_v28  ;;  %v786_v4 = vadd.f32 %v785_v3, %v784_v11  ;;  %v1035_v28 = vsel %vm661_vm3, %v892_v14, 0.0  ;;  %v1037_v18 = vsel %vm661_vm3, %v893_v45, 0.0 }
 0x17b   :  { %v896_v14 = vmul.f32 %v2191_v29, %v2191_v29 }
 0x17c   :  { %v1034_v51 = vadd.f32 %v1033_v34, %v1032_v12  ;;  %v788_v7 = vadd.f32 %v787_v40, %v786_v4  ;;  %v895_v12 = vmul.f32 %v2165_v19, %v2165_v19  ;;  %v1039_v34 = vsel %vm661_vm3, %v894_v52, 0.0 }
 0x17d   :  { %v1043_v52 = vsel %vm661_vm3, %v896_v14, 0.0 }
 0x17e   :  { %v790_v3 = vadd.f32 %v789_v47, %v788_v7  ;;  %v1036_v11 = vadd.f32 %v1035_v28, %v1034_v51  ;;  %v1041_v45 = vsel %vm661_vm3, %v895_v12, 0.0  ;;  %v795_v47 = vsel %vm661_vm3, %v2191_v29, 0.0 }
 0x17f   :  { %v897_v28 = vmul.f32 %v2219_v37, %v2219_v37 }
 0x180   :  { %v792_v40 = vadd.f32 %v791_v31, %v790_v3  ;;  %v1038_v4 = vadd.f32 %v1037_v18, %v1036_v11  ;;  %v797_v18 = vsel %vm661_vm3, %v2219_v37, 0.0  ;;  %v898_v31 = vmul.f32 %v2247_v57, %v2247_v57 }
 0x181   :  { %v1045_v12 = vsel %vm661_vm3, %v897_v28, 0.0 }
 0x182   :  { %v794_v7 = vadd.f32 %v793_v42, %v792_v40  ;;  %v1040_v51 = vadd.f32 %v1039_v34, %v1038_v4  ;;  %v799_v34 = vsel %vm661_vm3, %v2247_v57, 0.0  ;;  %v899_v42 = vmul.f32 %v2268_v53, %v2268_v53 }
 0x183   :  { %v1047_v14 = vsel %vm661_vm3, %v898_v31, 0.0 }
 0x184   :  { %v796_v3 = vadd.f32 %v795_v47, %v794_v7  ;;  %v1042_v11 = vadd.f32 %v1041_v45, %v1040_v51  ;;  %v801_v45 = vsel %vm661_vm3, %v2268_v53, 0.0  ;;  %v900_v47 = vmul.f32 %v2294_v15, %v2294_v15 }
 0x185   :  { %v1049_v28 = vsel %vm661_vm3, %v899_v42, 0.0 }
 0x186   :  { %v798_v40 = vadd.f32 %v797_v18, %v796_v3  ;;  %v1044_v4 = vadd.f32 %v1043_v52, %v1042_v11  ;;  %v803_v52 = vsel %vm661_vm3, %v2294_v15, 0.0  ;;  %v901_v18 = vmul.f32 %v2318_v41, %v2318_v41 }
 0x187   :  { %v1051_v31 = vsel %vm661_vm3, %v900_v47, 0.0 }
 0x188   :  { %v800_v7 = vadd.f32 %v799_v34, %v798_v40  ;;  %v1046_v51 = vadd.f32 %v1045_v12, %v1044_v4  ;;  %v805_v12 = vsel %vm661_vm3, %v2318_v41, 0.0  ;;  %v902_v34 = vmul.f32 %v2344_v13, %v2344_v13 }
 0x189   :  { %v1053_v42 = vsel %vm661_vm3, %v901_v18, 0.0 }
 0x18a   :  { %v1048_v3 = vadd.f32 %v1047_v14, %v1046_v51  ;;  %v802_v11 = vadd.f32 %v801_v45, %v800_v7  ;;  %v807_v14 = vsel %vm661_vm3, %v2344_v13, 0.0  ;;  %v903_v45 = vmul.f32 %v2370_v1, %v2370_v1 }
 0x18b   :  { %v1055_v47 = vsel %vm661_vm3, %v902_v34, 0.0 }
 0x18c   :  { %v804_v40 = vadd.f32 %v803_v52, %v802_v11  ;;  %v1050_v4 = vadd.f32 %v1049_v28, %v1048_v3  ;;  %v809_v28 = vsel %vm661_vm3, %v2370_v1, 0.0  ;;  %v904_v52 = vmul.f32 %v2394_v59, %v2394_v59 }
 0x18d   :  { %v1057_v18 = vsel %vm661_vm3, %v903_v45, 0.0 }
 0x18e   :  { %v806_v51 = vadd.f32 %v805_v12, %v804_v40  ;;  %v1052_v7 = vadd.f32 %v1051_v31, %v1050_v4  ;;  %v811_v31 = vsel %vm661_vm3, %v2394_v59, 0.0  ;;  %v905_v12 = vmul.f32 %v2418_v6, %v2418_v6 }
 0x18f   :  { %v1059_v34 = vsel %vm661_vm3, %v904_v52, 0.0 }
 0x190   :  { %v808_v11 = vadd.f32 %v807_v14, %v806_v51  ;;  %v1054_v3 = vadd.f32 %v1053_v42, %v1052_v7  ;;  %v813_v42 = vsel %vm661_vm3, %v2418_v6, 0.0  ;;  %v906_v14 = vmul.f32 %v2442_v20, %v2442_v20 }
 0x191   :  { %v1061_v45 = vsel %vm661_vm3, %v905_v12, 0.0 }
 0x192   :  { %v810_v40 = vadd.f32 %v809_v28, %v808_v11  ;;  %v1056_v4 = vadd.f32 %v1055_v47, %v1054_v3  ;;  %v815_v47 = vsel %vm661_vm3, %v2442_v20, 0.0  ;;  %v907_v28 = vmul.f32 %v2466_v30, %v2466_v30 }
 0x193   :  { %v1063_v52 = vsel %vm661_vm3, %v906_v14, 0.0 }
 0x194   :  { %v812_v51 = vadd.f32 %v811_v31, %v810_v40  ;;  %v1058_v7 = vadd.f32 %v1057_v18, %v1056_v4  ;;  %v817_v18 = vsel %vm661_vm3, %v2466_v30, 0.0  ;;  %v908_v31 = vmul.f32 %v2490_v49, %v2490_v49 }
 0x196   :  { %v814_v11 = vadd.f32 %v813_v42, %v812_v51  ;;  %v1060_v3 = vadd.f32 %v1059_v34, %v1058_v7  ;;  %v909_v51 = vmul.f32 %v2512_v26, %v2512_v26  ;;  %v1065_v34 = vsel %vm661_vm3, %v907_v28, 0.0 }
 0x197   :  { %v819_v42 = vsel %vm661_vm3, %v2490_v49, 0.0 }
 0x198   :  { %v1062_v40 = vadd.f32 %v1061_v45, %v1060_v3  ;;  %v816_v4 = vadd.f32 %v815_v47, %v814_v11  ;;  %v821_v11 = vsel %vm661_vm3, %v2512_v26, 0.0  ;;  %v1067_v45 = vsel %vm661_vm3, %v908_v31, 0.0 }
 0x199   :  { %v1069_v47 = vsel %vm661_vm3, %v909_v51, 0.0 }
 0x19a   :  { %v1064_v12 = vadd.f32 %v1063_v52, %v1062_v40  ;;  %v818_v7 = vadd.f32 %v817_v18, %v816_v4 }
 0x19c   :  { %v1066_v14 = vadd.f32 %v1065_v34, %v1064_v12  ;;  %v820_v3 = vadd.f32 %v819_v42, %v818_v7 }
 0x19e   :  { %v1068_v61 = vadd.f32 %v1067_v45, %v1066_v14  ;;  %v822_v24 = vadd.f32 %v821_v11, %v820_v3 }
 0x1a0   :  { %v823_v21 = vrot.slane %v822_v24, 4  ;;  %v1070_v2 = vadd.f32 %v1069_v47, %v1068_v61 }
 0x1a2   :  { %v824_v40 = vadd.f32 %v823_v21, %v822_v24  ;;  %v1071_v4 = vrot.slane %v1070_v2, 4 }
 0x1a4   :  { %v825_v52 = vrot.slane %v824_v40, 2  ;;  %v1072_v28 = vadd.f32 %v1071_v4, %v1070_v2 }
 0x1a6   :  { %v826_v18 = vadd.f32 %v825_v52, %v824_v40  ;;  %v1073_v48 = vrot.slane %v1072_v28, 2 }
 0x1a8   :  { %v827_v17 = vrot.slane %v826_v18, 1  ;;  %v1074_v22 = vadd.f32 %v1073_v48, %v1072_v28 }
 0x1aa   :  { %v828_v16 = vadd.f32 %v827_v17, %v826_v18  ;;  %v1075_v8 = vrot.slane %v1074_v22, 1 }
 0x1ac   :  { %v1076_v12 = vadd.f32 %v1075_v8, %v1074_v22  ;;  %v2620_v7 = vmul.f32 0.0015432099, %v828_v16  ;;  %v1082_v8 = vld [vmem:[%s3507_s2] sm:$0x1] }
 0x1ae   :  { %v1078_v31 = vmul.f32 0.0015432099, %v1076_v12  ;;  %v1079_v51 = vmul.f32 %v2620_v7, %v2620_v7  ;;  %v1158_v17 = vsub.f32 %v2519_v32, %v2620_v7  ;;  %v1159_v48 = vsub.f32 %v2125_v23, %v2620_v7 }
 0x1af   :  { %v1160_v45 = vsub.f32 %v2133_v27, %v2620_v7  ;;  %v1161_v40 = vsub.f32 %v2165_v19, %v2620_v7  ;;  %v1162_v4 = vsub.f32 %v2191_v29, %v2620_v7  ;;  %v1163_v52 = vsub.f32 %v2219_v37, %v2620_v7 }
 0x1b0   :  { %v1080_v34 = vsub.f32 %v1078_v31, %v1079_v51  ;;  %v1164_v32 = vsub.f32 %v2247_v57, %v2620_v7  ;;  %v1165_v23 = vsub.f32 %v2268_v53, %v2620_v7  ;;  %v1166_v27 = vsub.f32 %v2294_v15, %v2620_v7 }
 0x1b1   :  { %v1167_v28 = vsub.f32 %v2318_v41, %v2620_v7  ;;  %v1168_v19 = vsub.f32 %v2344_v13, %v2620_v7  ;;  %v1169_v29 = vsub.f32 %v2370_v1, %v2620_v7  ;;  %v1170_v37 = vsub.f32 %v2394_v59, %v2620_v7 }
 0x1b2   :  { %v1081_v42 = vmax.f32 %v1080_v34, 0.0  ;;  %v1171_v57 = vsub.f32 %v2418_v6, %v2620_v7  ;;  %v1172_v53 = vsub.f32 %v2442_v20, %v2620_v7  ;;  %v1173_v15 = vsub.f32 %v2466_v30, %v2620_v7 }
 0x1b3   :  { %v1174_v41 = vsub.f32 %v2490_v49, %v2620_v7  ;;  %v1175_v13 = vsub.f32 %v2512_v26, %v2620_v7 }
 0x1b4   :  { %v1083_v61 = vadd.f32 1e-05, %v1081_v42 }
 0x1b6   :  { %1852 = vrsqrt.f32 %v1083_v61  ;;  %vm1090_vm5 = vweird.f32 %v1083_v61 }
 0x1bc   :  { %v1853_v21 = vpop.eup %1852 }
 0x1bd   :  { %v1085_v24 = vmul.f32 %v1853_v21, %v1083_v61  ;;  %vm1091_vm4 = vweird.f32 %v1853_v21 }
 0x1be   :  { %vm1092_vm6 = vmor %vm1090_vm5, %vm1091_vm4 }
 0x1bf   :  { %v1086_v2 = vmul.f32 %v1853_v21, %v1085_v24 }
 0x1c1   :  { %v1087_v11 = vmul.f32 0.5, %v1086_v2 }
 0x1c3   :  { %v1088_v14 = vsub.f32 1.5, %v1087_v11 }
 0x1c5   :  { %v1089_v3 = vmul.f32 %v1853_v21, %v1088_v14  ;;  %v2686_v14 = vld [vmem:[%s3506_s3] ss:$0 sm:$0xff] }
 0x1c7   :  { %v1093_v16 = vsel %vm1092_vm6, %v1853_v21, %v1089_v3 }
 0x1c8   :  { %v1094_v22 = vmul.f32 %v1093_v16, %v1082_v8 }
 0x1ca   :  { %v2633_v47 = vperm.slane %v1094_v22, 0 }
 0x1cc   :  { %v1242_v1 = vmul.f32 %v2633_v47, %v1158_v17  ;;  %v1243_v18 = vmul.f32 %v2633_v47, %v1159_v48  ;;  %v1244_v59 = vmul.f32 %v2633_v47, %v1160_v45  ;;  %v1245_v6 = vmul.f32 %v2633_v47, %v1161_v40 }
 0x1cd   :  { %v1246_v12 = vmul.f32 %v2633_v47, %v1162_v4  ;;  %v1247_v20 = vmul.f32 %v2633_v47, %v1163_v52  ;;  %v1248_v30 = vmul.f32 %v2633_v47, %v1164_v32  ;;  %v1249_v31 = vmul.f32 %v2633_v47, %v1165_v23 }
 0x1ce   :  { %v1250_v49 = vmul.f32 %v2633_v47, %v1166_v27  ;;  %v1251_v26 = vmul.f32 %v2633_v47, %v1167_v28  ;;  %v1252_v51 = vmul.f32 %v2633_v47, %v1168_v19  ;;  %v1253_v34 = vmul.f32 %v2633_v47, %v1169_v29 }
 0x1cf   :  { %v1254_v42 = vmul.f32 %v2633_v47, %v1170_v37  ;;  %v1255_v61 = vmul.f32 %v2633_v47, %v1171_v57  ;;  %v1256_v21 = vmul.f32 %v2633_v47, %v1172_v53  ;;  %v1257_v24 = vmul.f32 %v2633_v47, %v1173_v15 }
 0x1d0   :  { %v1258_v2 = vmul.f32 %v2633_v47, %v1174_v41  ;;  %v1259_v11 = vmul.f32 %v2633_v47, %v1175_v13  ;;  %v2689_v3 = vadd.f32 %v2686_v14, %v1242_v1  ;;  %v2692_v8 = vadd.f32 %v2686_v14, %v1243_v18 }
 0x1d1   :  { %v2695_v16 = vadd.f32 %v2686_v14, %v1244_v59  ;;  %v2698_v22 = vadd.f32 %v2686_v14, %v1245_v6  ;;  %v2701_v17 = vadd.f32 %v2686_v14, %v1246_v12  ;;  %v2704_v48 = vadd.f32 %v2686_v14, %v1247_v20  ;;  %v3669_v20 = vld [vmem:[#allocation16_spill] sm:$0xff]  ;;  %v3675_v12 = vld [vmem:[#allocation37_spill] sm:$0xff] }
 0x1d2   :  { %3635 = vst [vmem:[#allocation44_spill] sm:$0xff] %v2689_v3  ;;  %v2707_v45 = vadd.f32 %v2686_v14, %v1248_v30  ;;  %v2710_v40 = vadd.f32 %v2686_v14, %v1249_v31  ;;  %v2713_v4 = vadd.f32 %v2686_v14, %v1250_v49  ;;  %v2716_v52 = vadd.f32 %v2686_v14, %v1251_v26  ;;  %v3666_v49 = vld [vmem:[#allocation5_spill] sm:$0xff]  ;;  %v3670_v31 = vld [vmem:[#allocation19_spill] sm:$0xff]  ;;  %v3672_v6 = vld [vmem:[#allocation28_spill] sm:$0xff] }
 0x1d3   :  { %3636 = vst [vmem:[#allocation45_spill] sm:$0xff] %v2692_v8  ;;  %v2719_v32 = vadd.f32 %v2686_v14, %v1252_v51  ;;  %v2722_v23 = vadd.f32 %v2686_v14, %v1253_v34  ;;  %v2725_v27 = vadd.f32 %v2686_v14, %v1254_v42  ;;  %v2728_v28 = vadd.f32 %v2686_v14, %v1255_v61  ;;  %v3660_v51 = vld [vmem:[#allocation22_spill] sm:$0xff]  ;;  %v3661_v42 = vld [vmem:[#allocation24_spill] sm:$0xff]  ;;  %v3668_v61 = vld [vmem:[#allocation11_spill] sm:$0xff] }
 0x1d4   :  { %3637 = vst [vmem:[#allocation46_spill] sm:$0xff] %v2695_v16  ;;  %v2731_v19 = vadd.f32 %v2686_v14, %v1256_v21  ;;  %v2734_v29 = vadd.f32 %v2686_v14, %v1257_v24  ;;  %v2737_v37 = vadd.f32 %v2686_v14, %v1258_v2  ;;  %v2740_v57 = vadd.f32 %v2686_v14, %v1259_v11  ;;  %v3662_v21 = vld [vmem:[#allocation27_spill] sm:$0xff]  ;;  %v3663_v2 = vld [vmem:[#allocation29_spill] sm:$0xff]  ;;  %v3664_v24 = vld [vmem:[#allocation2_spill] sm:$0xff] }
 0x1d5   :  { %3638 = vst [vmem:[#allocation47_spill] sm:$0xff] %v2698_v22  ;;  %v1095_v53 = vsub.f32 %v1995_v35, %v2620_v7  ;;  %v1096_v15 = vsub.f32 %v2005_v38, %v2620_v7  ;;  %v1097_v41 = vsub.f32 %v2019_v43, %v2620_v7  ;;  %v1098_v13 = vsub.f32 %v2029_v46, %v2620_v7  ;;  %v3653_v35 = vld [vmem:[#allocation6_spill] sm:$0xff]  ;;  %v3654_v38 = vld [vmem:[#allocation7_spill] sm:$0xff]  ;;  %v3656_v46 = vld [vmem:[#allocation13_spill] sm:$0xff] }
 0x1d6   :  { %3639 = vst [vmem:[#allocation48_spill] sm:$0xff] %v2701_v17  ;;  %v1099_v1 = vsub.f32 %v2040_v50, %v2620_v7  ;;  %v1100_v18 = vsub.f32 %v2051_v54, %v2620_v7  ;;  %v1101_v59 = vsub.f32 %v2061_v58, %v2620_v7  ;;  %v3655_v43 = vld [vmem:[#allocation10_spill] sm:$0xff]  ;;  %v3657_v50 = vld [vmem:[#allocation15_spill] sm:$0xff]  ;;  %v3658_v54 = vld [vmem:[#allocation17_spill] sm:$0xff] }
 0x1d7   :  { %3640 = vst [vmem:[#allocation49_spill] sm:$0xff] %v2704_v48  ;;  %v3659_v58 = vld [vmem:[#allocation20_spill] sm:$0xff]  ;;  %v3665_v11 = vld [vmem:[#allocation3_spill] sm:$0xff]  ;;  %v3671_v26 = vld [vmem:[#allocation25_spill] sm:$0xff]  ;;  %v1181_v17 = vmul.f32 %v2633_v47, %v1097_v41  ;;  %v1182_v8 = vmul.f32 %v2633_v47, %v1098_v13  ;;  %v3699_v22 = vsub.f32 %v3657_v50, %v2620_v7 }
 0x1d8   :  { %3641 = vst [vmem:[#allocation50_spill] sm:$0xff] %v2707_v45  ;;  %v3667_v34 = vld [vmem:[#allocation8_spill] sm:$0xff] }
 0x1d9   :  { %3642 = vst [vmem:[#allocation51_spill] sm:$0xff] %v2710_v40  ;;  %v1180_v40 = vmul.f32 %v2633_v47, %v1096_v15  ;;  %v1184_v15 = vmul.f32 %v2633_v47, %v1100_v18  ;;  %v3692_v18 = vsub.f32 %v3653_v35, %v2620_v7  ;;  %v1267_v3 = vadd.f32 %v2686_v14, %v1182_v8 }
 0x1da   :  { %3643 = vst [vmem:[#allocation52_spill] sm:$0xff] %v2713_v4  ;;  %v3680_v4 = vld [vmem:[#allocation14_spill] sm:$0xff]  ;;  %v3696_v35 = vsub.f32 %v3655_v43, %v2620_v7  ;;  %v1190_v43 = vmul.f32 %v2633_v47, %v3699_v22  ;;  %v3702_v22 = vsub.f32 %v3660_v51, %v2620_v7  ;;  %v3704_v51 = vsub.f32 %v3662_v21, %v2620_v7 }
 0x1db   :  { %3644 = vst [vmem:[#allocation53_spill] sm:$0xff] %v2716_v52  ;;  %v1265_v13 = vadd.f32 %v2686_v14, %v1180_v40  ;;  %v1186_v40 = vmul.f32 %v2633_v47, %v3692_v18  ;;  %v1269_v8 = vadd.f32 %v2686_v14, %v1184_v15  ;;  %v3700_v15 = vsub.f32 %v3658_v54, %v2620_v7 }
 0x1dc   :  { %3645 = vst [vmem:[#allocation54_spill] sm:$0xff] %v2719_v32  ;;  %v3678_v32 = vld [vmem:[#allocation9_spill] sm:$0xff]  ;;  %v1188_v18 = vmul.f32 %v2633_v47, %v3696_v35  ;;  %v1193_v50 = vmul.f32 %v2633_v47, %v3702_v22  ;;  %v3708_v22 = vsub.f32 %v1997_v36, %v2620_v7 }
 0x1dd   :  { %3646 = vst [vmem:[#allocation55_spill] sm:$0xff] %v2722_v23  ;;  %v1346_v45 = vmax.f32 %v1265_v13, 0.0  ;;  %v1191_v13 = vmul.f32 %v2633_v47, %v3700_v15  ;;  %v1271_v35 = vadd.f32 %v2686_v14, %v1186_v40  ;;  %v1348_v23 = vmax.f32 %v1267_v3, 0.0 }
 0x1de   :  { %3647 = vst [vmem:[#allocation56_spill] sm:$0xff] %v2725_v27  ;;  %v1179_v27 = vmul.f32 %v2633_v47, %v1095_v53  ;;  %v1183_v53 = vmul.f32 %v2633_v47, %v1099_v1  ;;  %v1185_v1 = vmul.f32 %v2633_v47, %v1101_v59  ;;  %v3694_v59 = vsub.f32 %v3654_v38, %v2620_v7 }
 0x1df   :  { %3648 = vst [vmem:[#allocation57_spill] sm:$0xff] %v2728_v28  ;;  %v3677_v28 = vld [vmem:[#allocation4_spill] sm:$0xff]  ;;  %v3698_v38 = vsub.f32 %v3656_v46, %v2620_v7  ;;  %v3701_v46 = vsub.f32 %v3659_v58, %v2620_v7  ;;  %v1273_v54 = vadd.f32 %v2686_v14, %v1188_v18  ;;  %v1350_v15 = vmax.f32 %v1269_v8, 0.0 }
 0x1e0   :  { %3649 = vst [vmem:[#allocation58_spill] sm:$0xff] %v2731_v19  ;;  %v3676_v19 = vld [vmem:[#allocation39_spill] sm:$0xff]  ;;  %v1264_v41 = vadd.f32 %v2686_v14, %v1179_v27  ;;  %v1266_v27 = vadd.f32 %v2686_v14, %v1181_v17  ;;  %v1187_v17 = vmul.f32 %v2633_v47, %v3694_v59  ;;  %v1268_v30 = vadd.f32 %v2686_v14, %v1183_v53 }
 0x1e1   :  { %3650 = vst [vmem:[#allocation59_spill] sm:$0xff] %v2734_v29  ;;  %v3674_v29 = vld [vmem:[#allocation35_spill] sm:$0xff]  ;;  %v1189_v53 = vmul.f32 %v2633_v47, %v3698_v38  ;;  %v1192_v38 = vmul.f32 %v2633_v47, %v3701_v46  ;;  %v3703_v3 = vsub.f32 %v3661_v42, %v2620_v7  ;;  %v1429_v16 = vpack.c.bf16 %v1348_v23, %v1348_v23 }
 0x1e2   :  { %3651 = vst [vmem:[#allocation60_spill] sm:$0xff] %v2737_v37  ;;  %v1345_v48 = vmax.f32 %v1264_v41, 0.0  ;;  %v1270_v41 = vadd.f32 %v2686_v14, %v1185_v1  ;;  %v1347_v59 = vmax.f32 %v1266_v27, 0.0  ;;  %v1272_v1 = vadd.f32 %v2686_v14, %v1187_v17 }
 0x1e3   :  { %3652 = vst [vmem:[#allocation61_spill] sm:$0xff] %v2740_v57  ;;  %v3673_v57 = vld [vmem:[#allocation31_spill] sm:$0xff]  ;;  %v1349_v27 = vmax.f32 %v1268_v30, 0.0  ;;  %v1427_v37 = vpack.c.bf16 %v1346_v45, %v1346_v45  ;;  %v1194_v58 = vmul.f32 %v2633_v47, %v3703_v3  ;;  %v1274_v40 = vadd.f32 %v2686_v14, %v1189_v53 }
 0x1e4   :  { %v1426_v52 = vpack.c.bf16 %v1345_v48, %v1345_v48  ;;  %v1351_v46 = vmax.f32 %v1270_v41, 0.0  ;;  %v1428_v17 = vpack.c.bf16 %v1347_v59, %v1347_v59  ;;  %v1275_v48 = vadd.f32 %v2686_v14, %v1190_v43  ;;  %1511 = vst.msk [vmem:[%s3508_s4 + $0xc] sm:$0xf] %vm1507_vm7, %v1429_v16 }
 0x1e5   :  { %v1352_v30 = vmax.f32 %v1271_v35, 0.0  ;;  %v1195_v18 = vmul.f32 %v2633_v47, %v3704_v51  ;;  %v1276_v45 = vadd.f32 %v2686_v14, %v1191_v13  ;;  %v1353_v8 = vmax.f32 %v1272_v1, 0.0  ;;  %1509 = vst.msk [vmem:[%s3508_s4 + $0x4] sm:$0xf] %vm1507_vm7, %v1427_v37 }
 0x1e6   :  { %v1430_v42 = vpack.c.bf16 %v1349_v27, %v1349_v27  ;;  %1508 = vst.msk [vmem:[%s3508_s4] sm:$0xf] %vm1507_vm7, %v1426_v52  ;;  %v3705_v53 = vsub.f32 %v3663_v2, %v2620_v7  ;;  %v1277_v41 = vadd.f32 %v2686_v14, %v1192_v38  ;;  %v1354_v59 = vmax.f32 %v1273_v54, 0.0 }
 0x1e7   :  { %v1431_v21 = vpack.c.bf16 %v1350_v15, %v1350_v15  ;;  %v3706_v43 = vsub.f32 %v2238_v33, %v2620_v7  ;;  %v1278_v52 = vadd.f32 %v2686_v14, %v1193_v50  ;;  %v1355_v35 = vmax.f32 %v1274_v40, 0.0  ;;  %1510 = vst.msk [vmem:[%s3508_s4 + $0x8] sm:$0xf] %vm1507_vm7, %v1428_v17 }
 0x1e8   :  { %v1196_v23 = vmul.f32 %v2633_v47, %v3705_v53  ;;  %v1432_v2 = vpack.c.bf16 %v1351_v46, %v1351_v46  ;;  %v3707_v38 = vsub.f32 %v2258_v9, %v2620_v7  ;;  %v1279_v37 = vadd.f32 %v2686_v14, %v1194_v58  ;;  %1512 = vst.msk [vmem:[%s3508_s4 + $0x10] sm:$0xf] %vm1507_vm7, %v1430_v42 }
 0x1e9   :  { %v1197_v13 = vmul.f32 %v2633_v47, %v3706_v43  ;;  %v1356_v27 = vmax.f32 %v1275_v48, 0.0  ;;  %v1433_v33 = vpack.c.bf16 %v1352_v30, %v1352_v30  ;;  %v1199_v50 = vmul.f32 %v2633_v47, %v3708_v22  ;;  %1513 = vst.msk [vmem:[%s3508_s4 + $0x14] sm:$0xf] %vm1507_vm7, %v1431_v21 }
 0x1ea   :  { %v1198_v1 = vmul.f32 %v2633_v47, %v3707_v38  ;;  %v1280_v54 = vadd.f32 %v2686_v14, %v1195_v18  ;;  %v1357_v15 = vmax.f32 %v1276_v45, 0.0  ;;  %v1434_v9 = vpack.c.bf16 %v1353_v8, %v1353_v8  ;;  %1514 = vst.msk [vmem:[%s3508_s4 + $0x18] sm:$0xf] %vm1507_vm7, %v1432_v2 }
 0x1eb   :  { %v3709_v3 = vsub.f32 %v2007_v39, %v2620_v7  ;;  %v1281_v16 = vadd.f32 %v2686_v14, %v1196_v23  ;;  %v1358_v40 = vmax.f32 %v1277_v41, 0.0  ;;  %v1435_v36 = vpack.c.bf16 %v1354_v59, %v1354_v59  ;;  %1515 = vst.msk [vmem:[%s3508_s4 + $0x1c] sm:$0xf] %vm1507_vm7, %v1433_v33 }
 0x1ec   :  { %v3710_v46 = vsub.f32 %v2021_v44, %v2620_v7  ;;  %v1282_v48 = vadd.f32 %v2686_v14, %v1197_v13  ;;  %v1359_v30 = vmax.f32 %v1278_v52, 0.0  ;;  %v1436_v39 = vpack.c.bf16 %v1355_v35, %v1355_v35  ;;  %1516 = vst.msk [vmem:[%s3508_s4 + $0x20] sm:$0xf] %vm1507_vm7, %v1434_v9 }
 0x1ed   :  { %v1200_v58 = vmul.f32 %v2633_v47, %v3709_v3  ;;  %v3711_v51 = vsub.f32 %v3664_v24, %v2620_v7  ;;  %v1283_v45 = vadd.f32 %v2686_v14, %v1198_v1  ;;  %v1360_v8 = vmax.f32 %v1279_v37, 0.0  ;;  %1517 = vst.msk [vmem:[%s3508_s4 + $0x24] sm:$0xf] %vm1507_vm7, %v1435_v36 }
 0x1ee   :  { %v1201_v17 = vmul.f32 %v2633_v47, %v3710_v46  ;;  %v1437_v44 = vpack.c.bf16 %v1356_v27, %v1356_v27  ;;  %v3712_v42 = vsub.f32 %v3665_v11, %v2620_v7  ;;  %v1284_v23 = vadd.f32 %v2686_v14, %v1199_v50  ;;  %1518 = vst.msk [vmem:[%s3508_s4 + $0x28] sm:$0xf] %vm1507_vm7, %v1436_v39 }
 0x1ef   :  { %v1202_v18 = vmul.f32 %v2633_v47, %v3711_v51  ;;  %v1361_v41 = vmax.f32 %v1280_v54, 0.0  ;;  %v1438_v24 = vpack.c.bf16 %v1357_v15, %v1357_v15  ;;  %v3713_v59 = vsub.f32 %v2053_v55, %v2620_v7 }
 0x1f0   :  { %v1203_v53 = vmul.f32 %v2633_v47, %v3712_v42  ;;  %v1285_v43 = vadd.f32 %v2686_v14, %v1200_v58  ;;  %v1362_v13 = vmax.f32 %v1281_v16, 0.0  ;;  %v1439_v11 = vpack.c.bf16 %v1358_v40, %v1358_v40  ;;  %1519 = vst.msk [vmem:[%s3508_s4 + $0x2c] sm:$0xf] %vm1507_vm7, %v1437_v44 }
 0x1f1   :  { %v1204_v21 = vmul.f32 %v2633_v47, %v3713_v59  ;;  %v3714_v52 = vsub.f32 %v3666_v49, %v2620_v7  ;;  %v1286_v2 = vadd.f32 %v2686_v14, %v1201_v17  ;;  %v1363_v38 = vmax.f32 %v1282_v48, 0.0  ;;  %1520 = vst.msk [vmem:[%s3508_s4 + $0x30] sm:$0xf] %vm1507_vm7, %v1438_v24 }
 0x1f2   :  { %v1440_v55 = vpack.c.bf16 %v1359_v30, %v1359_v30  ;;  %v3715_v1 = vsub.f32 %v2073_v63, %v2620_v7  ;;  %v1287_v27 = vadd.f32 %v2686_v14, %v1202_v18  ;;  %v1364_v33 = vmax.f32 %v1283_v45, 0.0  ;;  %1521 = vst.msk [vmem:[%s3508_s4 + $0x34] sm:$0xf] %vm1507_vm7, %v1439_v11 }
 0x1f3   :  { %v1205_v35 = vmul.f32 %v2633_v47, %v3714_v52  ;;  %v1441_v49 = vpack.c.bf16 %v1360_v8, %v1360_v8  ;;  %v3716_v22 = vsub.f32 %v3667_v34, %v2620_v7  ;;  %v1288_v54 = vadd.f32 %v2686_v14, %v1203_v53 }
 0x1f4   :  { %v1206_v37 = vmul.f32 %v2633_v47, %v3715_v1  ;;  %v1365_v15 = vmax.f32 %v1284_v23, 0.0  ;;  %v1442_v63 = vpack.c.bf16 %v1361_v41, %v1361_v41  ;;  %v3717_v9 = vsub.f32 %v3668_v61, %v2620_v7  ;;  %1522 = vst.msk [vmem:[%s3508_s4 + $0x38] sm:$0xf] %vm1507_vm7, %v1440_v55 }
 0x1f5   :  { %v1207_v50 = vmul.f32 %v2633_v47, %v3716_v22  ;;  %v1289_v58 = vadd.f32 %v2686_v14, %v1204_v21  ;;  %v1366_v16 = vmax.f32 %v1285_v43, 0.0  ;;  %v1443_v34 = vpack.c.bf16 %v1362_v13, %v1362_v13  ;;  %1523 = vst.msk [vmem:[%s3508_s4 + $0x3c] sm:$0xf] %vm1507_vm7, %v1441_v49 }
 0x1f6   :  { %v1208_v3 = vmul.f32 %v2633_v47, %v3717_v9  ;;  %v3718_v40 = vsub.f32 %v2099_v10, %v2620_v7  ;;  %v1290_v46 = vadd.f32 %v2686_v14, %v1205_v35  ;;  %v1367_v17 = vmax.f32 %v1286_v2, 0.0  ;;  %1524 = vst.msk [vmem:[%s3508_s4 + $0x40] sm:$0xf] %vm1507_vm7, %v1442_v63 }
 0x1f7   :  { %v1444_v61 = vpack.c.bf16 %v1363_v38, %v1363_v38  ;;  %v3719_v48 = vsub.f32 %v3669_v20, %v2620_v7  ;;  %v1291_v39 = vadd.f32 %v2686_v14, %v1206_v37  ;;  %v1368_v51 = vmax.f32 %v1287_v27, 0.0  ;;  %1525 = vst.msk [vmem:[%s3508_s4 + $0x44] sm:$0xf] %vm1507_vm7, %v1443_v34 }
 0x1f8   :  { %v1209_v36 = vmul.f32 %v2633_v47, %v3718_v40  ;;  %v1445_v10 = vpack.c.bf16 %v1364_v33, %v1364_v33  ;;  %v3720_v18 = vsub.f32 %v3670_v31, %v2620_v7  ;;  %v1292_v8 = vadd.f32 %v2686_v14, %v1207_v50 }
 0x1f9   :  { %v1210_v30 = vmul.f32 %v2633_v47, %v3719_v48  ;;  %v1369_v44 = vmax.f32 %v1288_v54, 0.0  ;;  %v1446_v20 = vpack.c.bf16 %v1365_v15, %v1365_v15  ;;  %v3721_v42 = vsub.f32 %v2129_v25, %v2620_v7  ;;  %1526 = vst.msk [vmem:[%s3508_s4 + $0x48] sm:$0xf] %vm1507_vm7, %v1444_v61 }
 0x1fa   :  { %v1211_v45 = vmul.f32 %v2633_v47, %v3720_v18  ;;  %v1293_v23 = vadd.f32 %v2686_v14, %v1208_v3  ;;  %v1370_v41 = vmax.f32 %v1289_v58, 0.0  ;;  %v1447_v31 = vpack.c.bf16 %v1366_v16, %v1366_v16  ;;  %1527 = vst.msk [vmem:[%s3508_s4 + $0x4c] sm:$0xf] %vm1507_vm7, %v1445_v10 }
 0x1fb   :  { %v1212_v53 = vmul.f32 %v2633_v47, %v3721_v42  ;;  %v3722_v24 = vsub.f32 %v3671_v26, %v2620_v7  ;;  %v1294_v21 = vadd.f32 %v2686_v14, %v1209_v36  ;;  %v1371_v43 = vmax.f32 %v1290_v46, 0.0  ;;  %1528 = vst.msk [vmem:[%s3508_s4 + $0x50] sm:$0xf] %vm1507_vm7, %v1446_v20 }
 0x1fc   :  { %v1448_v25 = vpack.c.bf16 %v1367_v17, %v1367_v17  ;;  %v3723_v13 = vsub.f32 %v3672_v6, %v2620_v7  ;;  %v1295_v52 = vadd.f32 %v2686_v14, %v1210_v30  ;;  %v1372_v35 = vmax.f32 %v1291_v39, 0.0  ;;  %1529 = vst.msk [vmem:[%s3508_s4 + $0x54] sm:$0xf] %vm1507_vm7, %v1447_v31 }
 0x1fd   :  { %v1213_v59 = vmul.f32 %v2633_v47, %v3722_v24  ;;  %v1449_v26 = vpack.c.bf16 %v1368_v51, %v1368_v51  ;;  %v3724_v2 = vsub.f32 %v3673_v57, %v2620_v7  ;;  %v1296_v55 = vadd.f32 %v2686_v14, %v1211_v45 }
 0x1fe   :  { %v1214_v11 = vmul.f32 %v2633_v47, %v3723_v13  ;;  %v1373_v1 = vmax.f32 %v1292_v8, 0.0  ;;  %v1450_v6 = vpack.c.bf16 %v1369_v44, %v1369_v44  ;;  %v3725_v37 = vsub.f32 %v2260_v62, %v2620_v7  ;;  %1530 = vst.msk [vmem:[%s3508_s4 + $0x58] sm:$0xf] %vm1507_vm7, %v1448_v25 }
 0x1ff   :  { %v1215_v38 = vmul.f32 %v2633_v47, %v3724_v2  ;;  %v1297_v33 = vadd.f32 %v2686_v14, %v1212_v53  ;;  %v1374_v49 = vmax.f32 %v1293_v23, 0.0  ;;  %v1451_v57 = vpack.c.bf16 %v1370_v41, %v1370_v41  ;;  %1531 = vst.msk [vmem:[%s3508_s4 + $0x5c] sm:$0xf] %vm1507_vm7, %v1449_v26 }
 0x200   :  { %v1216_v27 = vmul.f32 %v2633_v47, %v3725_v37  ;;  %v3726_v22 = vsub.f32 %v2292_v5, %v2620_v7  ;;  %v1298_v54 = vadd.f32 %v2686_v14, %v1213_v59  ;;  %v1375_v15 = vmax.f32 %v1294_v21, 0.0  ;;  %1532 = vst.msk [vmem:[%s3508_s4 + $0x60] sm:$0xf] %vm1507_vm7, %v1450_v6 }
 0x201   :  { %v1452_v62 = vpack.c.bf16 %v1371_v43, %v1371_v43  ;;  %v3727_v63 = vsub.f32 %v3674_v29, %v2620_v7  ;;  %v1299_v3 = vadd.f32 %v2686_v14, %v1214_v11  ;;  %v1376_v58 = vmax.f32 %v1295_v52, 0.0  ;;  %1533 = vst.msk [vmem:[%s3508_s4 + $0x64] sm:$0xf] %vm1507_vm7, %v1451_v57  ;;  %v3735_v11 = vld [vmem:[#allocation12_spill] sm:$0xff] }
 0x202   :  { %v1217_v50 = vmul.f32 %v2633_v47, %v3726_v22  ;;  %v1453_v5 = vpack.c.bf16 %v1372_v35, %v1372_v35  ;;  %v3728_v16 = vsub.f32 %v3675_v12, %v2620_v7  ;;  %v1300_v40 = vadd.f32 %v2686_v14, %v1215_v38 }
 0x203   :  { %v1218_v9 = vmul.f32 %v2633_v47, %v3727_v63  ;;  %v1377_v36 = vmax.f32 %v1296_v55, 0.0  ;;  %v1454_v29 = vpack.c.bf16 %v1373_v1, %v1373_v1  ;;  %v3729_v46 = vsub.f32 %v3676_v19, %v2620_v7  ;;  %1534 = vst.msk [vmem:[%s3508_s4 + $0x68] sm:$0xf] %vm1507_vm7, %v1452_v62 }
 0x204   :  { %v1219_v34 = vmul.f32 %v2633_v47, %v3728_v16  ;;  %v1301_v61 = vadd.f32 %v2686_v14, %v1216_v27  ;;  %v1378_v48 = vmax.f32 %v1297_v33, 0.0  ;;  %v1455_v12 = vpack.c.bf16 %v1374_v49, %v1374_v49  ;;  %1535 = vst.msk [vmem:[%s3508_s4 + $0x6c] sm:$0xf] %vm1507_vm7, %v1453_v5  ;;  %v3738_v27 = vld [vmem:[#allocation18_spill] sm:$0xff] }
 0x205   :  { %v1220_v17 = vmul.f32 %v2633_v47, %v3729_v46  ;;  %v3730_v30 = vsub.f32 %v3677_v28, %v2620_v7  ;;  %v1302_v51 = vadd.f32 %v2686_v14, %v1217_v50  ;;  %v1379_v10 = vmax.f32 %v1298_v54, 0.0  ;;  %1536 = vst.msk [vmem:[%s3508_s4 + $0x70] sm:$0xf] %vm1507_vm7, %v1454_v29  ;;  %v3740_v50 = vld [vmem:[#allocation21_spill] sm:$0xff] }
 0x206   :  { %v1456_v19 = vpack.c.bf16 %v1375_v15, %v1375_v15  ;;  %v3731_v18 = vsub.f32 %v2055_v56, %v2620_v7  ;;  %v1303_v8 = vadd.f32 %v2686_v14, %v1218_v9  ;;  %v1380_v44 = vmax.f32 %v1299_v3, 0.0  ;;  %1537 = vst.msk [vmem:[%s3508_s4 + $0x74] sm:$0xf] %vm1507_vm7, %v1455_v12  ;;  %v3742_v3 = vld [vmem:[#allocation23_spill] sm:$0xff]  ;;  %v3746_v12 = vld [vmem:[#allocation30_spill] sm:$0xff] }
 0x207   :  { %v1221_v39 = vmul.f32 %v2633_v47, %v3730_v30  ;;  %v1457_v28 = vpack.c.bf16 %v1376_v58, %v1376_v58  ;;  %v3732_v20 = vsub.f32 %v2065_v60, %v2620_v7  ;;  %v1304_v53 = vadd.f32 %v2686_v14, %v1219_v34 }
 0x208   :  { %v1222_v45 = vmul.f32 %v2633_v47, %v3731_v18  ;;  %v1381_v23 = vmax.f32 %v1300_v40, 0.0  ;;  %v1458_v56 = vpack.c.bf16 %v1377_v36, %v1377_v36  ;;  %v3733_v41 = vsub.f32 %v2075_v0, %v2620_v7  ;;  %1538 = vst.msk [vmem:[%s3508_s4 + $0x78] sm:$0xf] %vm1507_vm7, %v1456_v19  ;;  %v3744_v36 = vld [vmem:[#allocation26_spill] sm:$0xff]  ;;  %v3748_v18 = vld [vmem:[#allocation32_spill] sm:$0xff] }
 0x209   :  { %v1223_v42 = vmul.f32 %v2633_v47, %v3732_v20  ;;  %v1305_v24 = vadd.f32 %v2686_v14, %v1220_v17  ;;  %v1382_v59 = vmax.f32 %v1301_v61, 0.0  ;;  %v1459_v60 = vpack.c.bf16 %v1378_v48, %v1378_v48  ;;  %1539 = vst.msk [vmem:[%s3508_s4 + $0x7c] sm:$0xf] %vm1507_vm7, %v1457_v28 }
 0x20a   :  { %v1224_v31 = vmul.f32 %v2633_v47, %v3733_v41  ;;  %v3734_v21 = vsub.f32 %v3678_v32, %v2620_v7  ;;  %v1306_v25 = vadd.f32 %v2686_v14, %v1221_v39  ;;  %v1383_v13 = vmax.f32 %v1302_v51, 0.0  ;;  %1540 = vst.msk [vmem:[%s3508_s4 + $0x80] sm:$0xf] %vm1507_vm7, %v1458_v56 }
 0x20b   :  { %v1460_v0 = vpack.c.bf16 %v1379_v10, %v1379_v10  ;;  %v3736_v52 = vsub.f32 %v3735_v11, %v2620_v7  ;;  %v1307_v26 = vadd.f32 %v2686_v14, %v1222_v45  ;;  %v1384_v2 = vmax.f32 %v1303_v8, 0.0  ;;  %1541 = vst.msk [vmem:[%s3508_s4 + $0x84] sm:$0xf] %vm1507_vm7, %v1459_v60 }
 0x20c   :  { %v1225_v43 = vmul.f32 %v2633_v47, %v3734_v21  ;;  %v1461_v32 = vpack.c.bf16 %v1380_v44, %v1380_v44  ;;  %v3737_v38 = vsub.f32 %v3680_v4, %v2620_v7  ;;  %v1308_v1 = vadd.f32 %v2686_v14, %v1223_v42  ;;  %v3750_v42 = vld [vmem:[#allocation33_spill] sm:$0xff] }
 0x20d   :  { %v1226_v35 = vmul.f32 %v2633_v47, %v3736_v52  ;;  %v1385_v6 = vmax.f32 %v1304_v53, 0.0  ;;  %v1462_v37 = vpack.c.bf16 %v1381_v23, %v1381_v23  ;;  %v3739_v33 = vsub.f32 %v3738_v27, %v2620_v7  ;;  %1542 = vst.msk [vmem:[%s3508_s4 + $0x88] sm:$0xf] %vm1507_vm7, %v1460_v0 }
 0x20e   :  { %v1227_v55 = vmul.f32 %v2633_v47, %v3737_v38  ;;  %v1309_v57 = vadd.f32 %v2686_v14, %v1224_v31  ;;  %v1386_v22 = vmax.f32 %v1305_v24, 0.0  ;;  %v1463_v4 = vpack.c.bf16 %v1382_v59, %v1382_v59  ;;  %1543 = vst.msk [vmem:[%s3508_s4 + $0x8c] sm:$0xf] %vm1507_vm7, %v1461_v32  ;;  %v3752_v24 = vld [vmem:[#allocation34_spill] sm:$0xff] }
 0x20f   :  { %v1228_v49 = vmul.f32 %v2633_v47, %v3739_v33  ;;  %v3741_v54 = vsub.f32 %v3740_v50, %v2620_v7  ;;  %v1310_v62 = vadd.f32 %v2686_v14, %v1225_v43  ;;  %v1387_v63 = vmax.f32 %v1306_v25, 0.0  ;;  %1544 = vst.msk [vmem:[%s3508_s4 + $0x90] sm:$0xf] %vm1507_vm7, %v1462_v37  ;;  %v3758_v37 = vld [vmem:[#allocation40_spill] sm:$0xff] }
 0x210   :  { %v1464_v9 = vpack.c.bf16 %v1383_v13, %v1383_v13  ;;  %v3743_v58 = vsub.f32 %v3742_v3, %v2620_v7  ;;  %v1311_v16 = vadd.f32 %v2686_v14, %v1226_v35  ;;  %v1388_v34 = vmax.f32 %v1307_v26, 0.0  ;;  %1545 = vst.msk [vmem:[%s3508_s4 + $0x94] sm:$0xf] %vm1507_vm7, %v1463_v4  ;;  %v3754_v13 = vld [vmem:[#allocation36_spill] sm:$0xff]  ;;  %v3760_v4 = vld [vmem:[#allocation41_spill] sm:$0xff] }
 0x211   :  { %v1229_v15 = vmul.f32 %v2633_v47, %v3741_v54  ;;  %v1465_v40 = vpack.c.bf16 %v1384_v2, %v1384_v2  ;;  %v3745_v29 = vsub.f32 %v3744_v36, %v2620_v7  ;;  %v1312_v17 = vadd.f32 %v2686_v14, %v1227_v55  ;;  %v3756_v2 = vld [vmem:[#allocation38_spill] sm:$0xff] }
 0x212   :  { %v1230_v5 = vmul.f32 %v2633_v47, %v3743_v58  ;;  %v1389_v61 = vmax.f32 %v1308_v1, 0.0  ;;  %v1466_v48 = vpack.c.bf16 %v1385_v6, %v1385_v6  ;;  %v3747_v30 = vsub.f32 %v3746_v12, %v2620_v7  ;;  %1546 = vst.msk [vmem:[%s3508_s4 + $0x98] sm:$0xf] %vm1507_vm7, %v1464_v9  ;;  %v3762_v9 = vld [vmem:[#allocation42_spill] sm:$0xff] }
 0x213   :  { %v1231_v46 = vmul.f32 %v2633_v47, %v3745_v29  ;;  %v1313_v51 = vadd.f32 %v2686_v14, %v1228_v49  ;;  %v1390_v10 = vmax.f32 %v1309_v57, 0.0  ;;  %v1467_v19 = vpack.c.bf16 %v1386_v22, %v1386_v22  ;;  %1547 = vst.msk [vmem:[%s3508_s4 + $0x9c] sm:$0xf] %vm1507_vm7, %v1465_v40  ;;  %v3764_v40 = vld [vmem:[#allocation43_spill] sm:$0xff] }
 0x214   :  { %v1232_v39 = vmul.f32 %v2633_v47, %v3747_v30  ;;  %v3749_v45 = vsub.f32 %v3748_v18, %v2620_v7  ;;  %v1314_v44 = vadd.f32 %v2686_v14, %v1229_v15  ;;  %v1391_v28 = vmax.f32 %v1310_v62, 0.0  ;;  %1548 = vst.msk [vmem:[%s3508_s4 + $0xa0] sm:$0xf] %vm1507_vm7, %v1466_v48 }
 0x215   :  { %v1468_v20 = vpack.c.bf16 %v1387_v63, %v1387_v63  ;;  %v3751_v53 = vsub.f32 %v3750_v42, %v2620_v7  ;;  %v1315_v56 = vadd.f32 %v2686_v14, %v1230_v5  ;;  %v1392_v41 = vmax.f32 %v1311_v16, 0.0  ;;  %1549 = vst.msk [vmem:[%s3508_s4 + $0xa4] sm:$0xf] %vm1507_vm7, %v1467_v19 }
 0x216   :  { %v1233_v8 = vmul.f32 %v2633_v47, %v3749_v45  ;;  %v1469_v31 = vpack.c.bf16 %v1388_v34, %v1388_v34  ;;  %v3753_v59 = vsub.f32 %v3752_v24, %v2620_v7  ;;  %v1316_v21 = vadd.f32 %v2686_v14, %v1231_v46 }
 0x217   :  { %v1234_v23 = vmul.f32 %v2633_v47, %v3751_v53  ;;  %v1393_v43 = vmax.f32 %v1312_v17, 0.0  ;;  %v1470_v25 = vpack.c.bf16 %v1389_v61, %v1389_v61  ;;  %v3755_v0 = vsub.f32 %v3754_v13, %v2620_v7  ;;  %1550 = vst.msk [vmem:[%s3508_s4 + $0xa8] sm:$0xf] %vm1507_vm7, %v1468_v20 }
 0x218   :  { %v1235_v60 = vmul.f32 %v2633_v47, %v3753_v59  ;;  %v1317_v52 = vadd.f32 %v2686_v14, %v1232_v39  ;;  %v1394_v35 = vmax.f32 %v1313_v51, 0.0  ;;  %v1471_v26 = vpack.c.bf16 %v1390_v10, %v1390_v10  ;;  %1551 = vst.msk [vmem:[%s3508_s4 + $0xac] sm:$0xf] %vm1507_vm7, %v1469_v31  ;;  %v3767_v59 = vld [vmem:[#allocation45_spill] sm:$0xff] }
 0x219   :  { %v1236_v11 = vmul.f32 %v2633_v47, %v3755_v0  ;;  %v3757_v32 = vsub.f32 %v3756_v2, %v2620_v7  ;;  %v1318_v55 = vadd.f32 %v2686_v14, %v1233_v8  ;;  %v1395_v1 = vmax.f32 %v1314_v44, 0.0  ;;  %1552 = vst.msk [vmem:[%s3508_s4 + $0xb0] sm:$0xf] %vm1507_vm7, %v1470_v25  ;;  %v3769_v0 = vld [vmem:[#allocation47_spill] sm:$0xff] }
 0x21a   :  { %v1472_v6 = vpack.c.bf16 %v1391_v28, %v1391_v28  ;;  %v3759_v27 = vsub.f32 %v3758_v37, %v2620_v7  ;;  %v1319_v49 = vadd.f32 %v2686_v14, %v1234_v23  ;;  %v1396_v57 = vmax.f32 %v1315_v56, 0.0  ;;  %1553 = vst.msk [vmem:[%s3508_s4 + $0xb4] sm:$0xf] %vm1507_vm7, %v1471_v26 }
 0x21b   :  { %v1237_v38 = vmul.f32 %v2633_v47, %v3757_v32  ;;  %v1473_v22 = vpack.c.bf16 %v1392_v41, %v1392_v41  ;;  %v3761_v50 = vsub.f32 %v3760_v4, %v2620_v7  ;;  %v1320_v15 = vadd.f32 %v2686_v14, %v1235_v60  ;;  %v3766_v41 = vld [vmem:[#allocation44_spill] sm:$0xff]  ;;  %v3771_v32 = vld [vmem:[#allocation49_spill] sm:$0xff] }
 0x21c   :  { %v1238_v33 = vmul.f32 %v2633_v47, %v3759_v27  ;;  %v1397_v62 = vmax.f32 %v1316_v21, 0.0  ;;  %v1474_v63 = vpack.c.bf16 %v1393_v43, %v1393_v43  ;;  %v3763_v3 = vsub.f32 %v3762_v9, %v2620_v7  ;;  %1554 = vst.msk [vmem:[%s3508_s4 + $0xb8] sm:$0xf] %vm1507_vm7, %v1472_v6  ;;  %v3768_v43 = vld [vmem:[#allocation46_spill] sm:$0xff]  ;;  %v3773_v27 = vld [vmem:[#allocation51_spill] sm:$0xff] }
 0x21d   :  { %v1239_v54 = vmul.f32 %v2633_v47, %v3761_v50  ;;  %v1321_v5 = vadd.f32 %v2686_v14, %v1236_v11  ;;  %v1398_v16 = vmax.f32 %v1317_v52, 0.0  ;;  %v1475_v34 = vpack.c.bf16 %v1394_v35, %v1394_v35  ;;  %1555 = vst.msk [vmem:[%s3508_s4 + $0xbc] sm:$0xf] %vm1507_vm7, %v1473_v22  ;;  %v3770_v35 = vld [vmem:[#allocation48_spill] sm:$0xff]  ;;  %v3775_v50 = vld [vmem:[#allocation53_spill] sm:$0xff] }
 0x21e   :  { %v1240_v58 = vmul.f32 %v2633_v47, %v3763_v3  ;;  %v3765_v36 = vsub.f32 %v3764_v40, %v2620_v7  ;;  %v1322_v46 = vadd.f32 %v2686_v14, %v1237_v38  ;;  %v1399_v17 = vmax.f32 %v1318_v55, 0.0  ;;  %1556 = vst.msk [vmem:[%s3508_s4 + $0xc0] sm:$0xf] %vm1507_vm7, %v1474_v63  ;;  %v3777_v3 = vld [vmem:[#allocation55_spill] sm:$0xff] }
 0x21f   :  { %v1476_v61 = vpack.c.bf16 %v1395_v1, %v1395_v1  ;;  %v1323_v48 = vadd.f32 %v2686_v14, %v1238_v33  ;;  %v1400_v12 = vmax.f32 %v1319_v49, 0.0  ;;  %v1477_v30 = vpack.c.bf16 %v1396_v57, %v1396_v57  ;;  %1557 = vst.msk [vmem:[%s3508_s4 + $0xc4] sm:$0xf] %vm1507_vm7, %v1475_v34  ;;  %v3772_v1 = vld [vmem:[#allocation50_spill] sm:$0xff]  ;;  %v3774_v57 = vld [vmem:[#allocation52_spill] sm:$0xff] }
 0x220   :  { %v1241_v29 = vmul.f32 %v2633_v47, %v3765_v36  ;;  %v1324_v7 = vadd.f32 %v2686_v14, %v1239_v54  ;;  %v1401_v47 = vmax.f32 %v1320_v15, 0.0  ;;  %v1478_v39 = vpack.c.bf16 %v1397_v62, %v1397_v62  ;;  %v3776_v62 = vld [vmem:[#allocation54_spill] sm:$0xff]  ;;  %v3779_v36 = vld [vmem:[#allocation57_spill] sm:$0xff] }
 0x221   :  { %v1325_v51 = vadd.f32 %v2686_v14, %v1240_v58  ;;  %v1402_v10 = vmax.f32 %v1321_v5, 0.0  ;;  %v1479_v19 = vpack.c.bf16 %v1398_v16, %v1398_v16  ;;  %v1403_v45 = vmax.f32 %v1322_v46, 0.0  ;;  %1558 = vst.msk [vmem:[%s3508_s4 + $0xc8] sm:$0xf] %vm1507_vm7, %v1476_v61  ;;  %v3778_v16 = vld [vmem:[#allocation56_spill] sm:$0xff] }
 0x222   :  { %v1326_v18 = vadd.f32 %v2686_v14, %v1241_v29  ;;  %v1480_v8 = vpack.c.bf16 %v1399_v17, %v1399_v17  ;;  %v1404_v44 = vmax.f32 %v1323_v48, 0.0  ;;  %v1481_v28 = vpack.c.bf16 %v1400_v12, %v1400_v12  ;;  %1559 = vst.msk [vmem:[%s3508_s4 + $0xcc] sm:$0xf] %vm1507_vm7, %v1477_v30  ;;  %v3780_v17 = vld [vmem:[#allocation58_spill] sm:$0xff]  ;;  %v3781_v12 = vld [vmem:[#allocation59_spill] sm:$0xff] }
 0x223   :  { %v1405_v20 = vmax.f32 %v1324_v7, 0.0  ;;  %v1482_v42 = vpack.c.bf16 %v1401_v47, %v1401_v47  ;;  %1560 = vst.msk [vmem:[%s3508_s4 + $0xd0] sm:$0xf] %vm1507_vm7, %v1478_v39  ;;  %v1406_v14 = vmax.f32 %v1325_v51, 0.0  ;;  %v1483_v53 = vpack.c.bf16 %v1402_v10, %v1402_v10  ;;  %v3782_v47 = vld [vmem:[#allocation60_spill] sm:$0xff]  ;;  %v3783_v10 = vld [vmem:[#allocation61_spill] sm:$0xff] }
 0x224   :  { %1561 = vst.msk [vmem:[%s3508_s4 + $0xd4] sm:$0xf] %vm1507_vm7, %v1479_v19  ;;  %v1407_v23 = vmax.f32 %v1326_v18, 0.0  ;;  %v1484_v56 = vpack.c.bf16 %v1403_v45, %v1403_v45  ;;  %v1408_v31 = vmax.f32 %v3766_v41, 0.0  ;;  %v1485_v24 = vpack.c.bf16 %v1404_v44, %v1404_v44 }
 0x225   :  { %1562 = vst.msk [vmem:[%s3508_s4 + $0xd8] sm:$0xf] %vm1507_vm7, %v1480_v8  ;;  %v1409_v60 = vmax.f32 %v3767_v59, 0.0  ;;  %v1486_v21 = vpack.c.bf16 %v1405_v20, %v1405_v20  ;;  %v1410_v25 = vmax.f32 %v3768_v43, 0.0  ;;  %v1487_v13 = vpack.c.bf16 %v1406_v14, %v1406_v14 }
 0x226   :  { %1563 = vst.msk [vmem:[%s3508_s4 + $0xdc] sm:$0xf] %vm1507_vm7, %v1481_v28  ;;  %v1411_v11 = vmax.f32 %v3769_v0, 0.0  ;;  %v1488_v52 = vpack.c.bf16 %v1407_v23, %v1407_v23  ;;  %v1412_v26 = vmax.f32 %v3770_v35, 0.0  ;;  %v1489_v2 = vpack.c.bf16 %v1408_v31, %v1408_v31 }
 0x227   :  { %1564 = vst.msk [vmem:[%s3508_s4 + $0xe0] sm:$0xf] %vm1507_vm7, %v1482_v42  ;;  %v1413_v38 = vmax.f32 %v3771_v32, 0.0  ;;  %v1490_v55 = vpack.c.bf16 %v1409_v60, %v1409_v60  ;;  %v1414_v6 = vmax.f32 %v3772_v1, 0.0  ;;  %v1491_v37 = vpack.c.bf16 %v1410_v25, %v1410_v25 }
 0x228   :  { %1565 = vst.msk [vmem:[%s3508_s4 + $0xe4] sm:$0xf] %vm1507_vm7, %v1483_v53  ;;  %v1415_v33 = vmax.f32 %v3773_v27, 0.0  ;;  %v1492_v49 = vpack.c.bf16 %v1411_v11, %v1411_v11  ;;  %v1416_v22 = vmax.f32 %v3774_v57, 0.0  ;;  %v1493_v4 = vpack.c.bf16 %v1412_v26, %v1412_v26 }
 0x229   :  { %1566 = vst.msk [vmem:[%s3508_s4 + $0xe8] sm:$0xf] %vm1507_vm7, %v1484_v56  ;;  %v1417_v54 = vmax.f32 %v3775_v50, 0.0  ;;  %v1494_v15 = vpack.c.bf16 %v1413_v38, %v1413_v38  ;;  %v1418_v63 = vmax.f32 %v3776_v62, 0.0  ;;  %v1495_v9 = vpack.c.bf16 %v1414_v6, %v1414_v6 }
 0x22a   :  { %1567 = vst.msk [vmem:[%s3508_s4 + $0xec] sm:$0xf] %vm1507_vm7, %v1485_v24  ;;  %v1419_v58 = vmax.f32 %v3777_v3, 0.0  ;;  %v1496_v5 = vpack.c.bf16 %v1415_v33, %v1415_v33  ;;  %v1420_v34 = vmax.f32 %v3778_v16, 0.0  ;;  %v1497_v40 = vpack.c.bf16 %v1416_v22, %v1416_v22 }
 0x22b   :  { %1568 = vst.msk [vmem:[%s3508_s4 + $0xf0] sm:$0xf] %vm1507_vm7, %v1486_v21  ;;  %v1421_v29 = vmax.f32 %v3779_v36, 0.0  ;;  %v1498_v46 = vpack.c.bf16 %v1417_v54, %v1417_v54  ;;  %v1422_v61 = vmax.f32 %v3780_v17, 0.0  ;;  %v1499_v48 = vpack.c.bf16 %v1418_v63, %v1418_v63 }
 0x22c   :  { %1569 = vst.msk [vmem:[%s3508_s4 + $0xf4] sm:$0xf] %vm1507_vm7, %v1487_v13  ;;  %v1423_v30 = vmax.f32 %v3781_v12, 0.0  ;;  %v1500_v7 = vpack.c.bf16 %v1419_v58, %v1419_v58  ;;  %v1424_v39 = vmax.f32 %v3782_v47, 0.0  ;;  %v1501_v51 = vpack.c.bf16 %v1420_v34, %v1420_v34 }
 0x22d   :  { %1570 = vst.msk [vmem:[%s3508_s4 + $0xf8] sm:$0xf] %vm1507_vm7, %v1488_v52  ;;  %v1425_v19 = vmax.f32 %v3783_v10, 0.0  ;;  %v1502_v18 = vpack.c.bf16 %v1421_v29, %v1421_v29  ;;  %v1503_v45 = vpack.c.bf16 %v1422_v61, %v1422_v61 }
 0x22e   :  { %1571 = vst.msk [vmem:[%s3508_s4 + $0xfc] sm:$0xf] %vm1507_vm7, %v1489_v2  ;;  %v1504_v8 = vpack.c.bf16 %v1423_v30, %v1423_v30  ;;  %v1505_v44 = vpack.c.bf16 %v1424_v39, %v1424_v39 }
 0x22f   :  { %1572 = vst.msk [vmem:[%s3508_s4 + $0x100] sm:$0xf] %vm1507_vm7, %v1490_v55  ;;  %v1506_v28 = vpack.c.bf16 %v1425_v19, %v1425_v19 }
 0x230   :  { %1573 = vst.msk [vmem:[%s3508_s4 + $0x104] sm:$0xf] %vm1507_vm7, %v1491_v37 }
 0x231   :  { %1574 = vst.msk [vmem:[%s3508_s4 + $0x108] sm:$0xf] %vm1507_vm7, %v1492_v49 }
 0x232   :  { %1575 = vst.msk [vmem:[%s3508_s4 + $0x10c] sm:$0xf] %vm1507_vm7, %v1493_v4 }
 0x233   :  { %1576 = vst.msk [vmem:[%s3508_s4 + $0x110] sm:$0xf] %vm1507_vm7, %v1494_v15 }
 0x234   :  { %1577 = vst.msk [vmem:[%s3508_s4 + $0x114] sm:$0xf] %vm1507_vm7, %v1495_v9 }
 0x235   :  { %1578 = vst.msk [vmem:[%s3508_s4 + $0x118] sm:$0xf] %vm1507_vm7, %v1496_v5 }
 0x236   :  { %1579 = vst.msk [vmem:[%s3508_s4 + $0x11c] sm:$0xf] %vm1507_vm7, %v1497_v40 }
 0x237   :  { %1580 = vst.msk [vmem:[%s3508_s4 + $0x120] sm:$0xf] %vm1507_vm7, %v1498_v46 }
 0x238   :  { %1581 = vst.msk [vmem:[%s3508_s4 + $0x124] sm:$0xf] %vm1507_vm7, %v1499_v48 }
 0x239   :  { %1582 = vst.msk [vmem:[%s3508_s4 + $0x128] sm:$0xf] %vm1507_vm7, %v1500_v7 }
 0x23a   :  { %1583 = vst.msk [vmem:[%s3508_s4 + $0x12c] sm:$0xf] %vm1507_vm7, %v1501_v51 }
 0x23b   :  { %1584 = vst.msk [vmem:[%s3508_s4 + $0x130] sm:$0xf] %vm1507_vm7, %v1502_v18 }
 0x23c   :  { %1585 = vst.msk [vmem:[%s3508_s4 + $0x134] sm:$0xf] %vm1507_vm7, %v1503_v45 }
 0x23d   :  { %1586 = vst.msk [vmem:[%s3508_s4 + $0x138] sm:$0xf] %vm1507_vm7, %v1504_v8 }
 0x23e   :  { %1587 = vst.msk [vmem:[%s3508_s4 + $0x13c] sm:$0xf] %vm1507_vm7, %v1505_v44 }
 0x23f   :  { %1588 = vst.msk [vmem:[%s3508_s4 + $0x140] sm:$0xf] %vm1507_vm7, %v1506_v28 }

</bundles_post_ra>
